<compile_context>
chip_gen: v6e
topology: v6e:2x2x1
jax: 0.10.0
libtpu: 0.0.40
codegen_flags: <defaults>
</compile_context>

<pallas_src>
import jax
import jax.numpy as jnp
from jax.experimental import pallas as pl
from jax.experimental.pallas import tpu as pltpu

KH = 20             # conv kernel height (kernel_size = (20, 1))
MAX_ROW_TILE = 512  # batch rows per grid step for large N (multiple of 8)


def _fused_outconv_kernel(a_ref, w_ref, b_ref, o_ref):
    # a_ref: (tm, C*H*W)      flattened activations           (VMEM)
    # w_ref: (C*H*W, Hout*K)  Toeplitz-folded conv*FC weight  (VMEM, constant across grid)
    # b_ref: (1, Hout*K)      fused bias                      (VMEM, constant across grid)
    # o_ref: (tm, Hout*K)     fused output rows               (VMEM)
    acc = jnp.dot(a_ref[...], w_ref[...],
                  preferred_element_type=jnp.float32,
                  precision=jax.lax.Precision.HIGHEST)
    o_ref[...] = (acc + b_ref[...]).astype(o_ref.dtype)


def outconv_forward(x, conv_w, conv_b, fc_w, fc_b):
    N, C, H, W = x.shape
    assert conv_w.shape == (1, C, KH, 1), "OutConv conv must be Conv2d(C->1, kernel=(20,1))"
    assert conv_b.shape == (1,), "conv out_channels must be 1"
    K, Wf = fc_w.shape
    assert Wf == W, "Linear(in_features) must match input width"
    Hout = H - KH + 1
    Kc = C * H * W        # contraction size (whole flattened image)
    Nout = Hout * K       # fused output columns

    # ---- wrapper-side weight fusion (tiny, built once) -------------------------------
    cw = conv_w.reshape(C, KH).astype(jnp.float32)                 # (C, KH)
    fw = fc_w.astype(jnp.float32)                                  # (K, W)
    hp = jnp.arange(H)[:, None]                                    # h' (input row)
    hh = jnp.arange(Hout)[None, :]                                 # h  (output row)
    d = hp - hh                                                    # (H, Hout)
    valid = (d >= 0) & (d < KH)
    band = jnp.where(valid[None], cw[:, jnp.clip(d, 0, KH - 1)], 0.0)   # (C, H, Hout)
    # W_fused[(c,h',w),(h,k)] = band[c,h',h] * fw[k,w]
    w_fused = jnp.einsum("chH,kw->chwHk", band, fw).reshape(Kc, Nout)
    b_fused = fc_b.astype(jnp.float32) + conv_b.astype(jnp.float32)[0] * fw.sum(axis=1)
    b_fused = jnp.broadcast_to(b_fused[None, :], (Hout, K)).reshape(1, Nout)

    # ---- activations: free reshape of contiguous NCHW; read from HBM exactly once ----
    a = x.reshape(N, Kc).astype(jnp.float32)

    # Row tile: whole batch if it fits one step, else 512-row tiles (multiple of 8 so a
    # ragged final block is legal; ragged rows are safe since there is no cross-row
    # reduction and OOB output rows are masked).
    # NOTE: megacore (v7x) only shards when the grid has >= 2 steps (large N).
    tm = N if N <= MAX_ROW_TILE else MAX_ROW_TILE
    grid = (pl.cdiv(N, tm),)

    out = pl.pallas_call(
        _fused_outconv_kernel,
        out_shape=jax.ShapeDtypeStruct((N, Nout), jnp.float32),
        grid=grid,
        in_specs=[
            pl.BlockSpec((tm, Kc), lambda i: (i, 0)),      # last dim == full array extent
            pl.BlockSpec((Kc, Nout), lambda i: (0, 0)),    # whole weight, VMEM-resident
            pl.BlockSpec((1, Nout), lambda i: (0, 0)),     # whole bias, VMEM-resident
        ],
        out_specs=pl.BlockSpec((tm, Nout), lambda i: (i, 0)),
        compiler_params=pltpu.CompilerParams(
            dimension_semantics=("parallel",)),
    )(a, w_fused, b_fused)

    # Free reshape back to the PyTorch layout (N, 1, Hout, num_classes); no slice copy.
    return out.reshape(N, Hout, K)[:, None, :, :].astype(x.dtype)


def reference(x, conv_w, conv_b, fc_w, fc_b):
    # Pure-JAX reference mirroring the PyTorch forward pass.
    y = jax.lax.conv_general_dilated(
        x, conv_w, window_strides=(1, 1), padding="VALID",
        dimension_numbers=("NCHW", "OIHW", "NCHW"),
        precision=jax.lax.Precision.HIGHEST)
    y = y + conv_b.reshape(1, -1, 1, 1)
    y = jnp.einsum("nchw,kw->nchk", y, fc_w,
                   precision=jax.lax.Precision.HIGHEST) + fc_b
    return y


if __name__ == "__main__":
    N, C, H, W = 2, 4, 27, 5          # W must be 5 for Linear(in_features=5); H >= 20
    num_classes = 3

    key = jax.random.PRNGKey(0)
    k1, k2, k3, k4, k5 = jax.random.split(key, 5)
    conv_w = 0.1 * jax.random.normal(k1, (1, C, KH, 1), jnp.float32)
    conv_b = 0.1 * jax.random.normal(k2, (1,), jnp.float32)
    fc_w = 0.1 * jax.random.normal(k3, (num_classes, 5), jnp.float32)
    fc_b = 0.1 * jax.random.normal(k4, (num_classes,), jnp.float32)
    x = jax.random.normal(k5, (N, C, H, W), jnp.float32)

    out = outconv_forward(x, conv_w, conv_b, fc_w, fc_b)
    jax.block_until_ready(out)

    ref = reference(x, conv_w, conv_b, fc_w, fc_b)
    assert out.shape == (N, 1, H - KH + 1, num_classes), out.shape
    assert jnp.allclose(out, ref, atol=1e-3, rtol=1e-3), "mismatch vs reference"

    print("KERNEL_OK")
</pallas_src>

<mosaic_0001>
module attributes {stable_mosaic.version = 11 : i64} {
  func.func @_fused_outconv_kernel(%arg0: i32, %arg1: memref<2x540xf32, #tpu.memory_space<vmem>>, %arg2: memref<540x24xf32, #tpu.memory_space<vmem>>, %arg3: memref<1x24xf32, #tpu.memory_space<vmem>>, %arg4: memref<2x24xf32, #tpu.memory_space<vmem>>) attributes {dimension_semantics = [#tpu.dimension_semantics<parallel>], iteration_bounds = array<i64: 1>, scalar_prefetch = 0 : i64, scratch_operands = 0 : i64, tpu.core_type = #tpu.core_type<tc>, window_params = [{transform_indices = @transform_0, window_bounds = array<i64: 2, 540>}, {pipeline_mode = #tpu.pipeline_mode<synchronous>, transform_indices = @transform_1, window_bounds = array<i64: 540, 24>}, {pipeline_mode = #tpu.pipeline_mode<synchronous>, transform_indices = @transform_2, window_bounds = array<i64: 1, 24>}, {transform_indices = @transform_3, window_bounds = array<i64: 2, 24>}]} {
    %c0 = arith.constant 0 : index
    %c0_0 = arith.constant 0 : index
    %0 = vector.load %arg1[%c0, %c0_0] : memref<2x540xf32, #tpu.memory_space<vmem>>, vector<2x540xf32>
    %c0_1 = arith.constant 0 : index
    %c0_2 = arith.constant 0 : index
    %1 = vector.load %arg2[%c0_1, %c0_2] : memref<540x24xf32, #tpu.memory_space<vmem>>, vector<540x24xf32>
    %cst = arith.constant dense<0.000000e+00> : vector<2x24xf32>
    %2 = tpu.matmul %0, %1, %cst {dimension_numbers = #tpu.dot_dimension_numbers<[1], [0], [0], [1], [0, 0, 1, 1], [], []>, precision = #tpu.contract_precision<fp32>} : vector<2x540xf32>, vector<540x24xf32>, vector<2x24xf32> -> vector<2x24xf32>
    %c0_3 = arith.constant 0 : index
    %c0_4 = arith.constant 0 : index
    %3 = vector.load %arg3[%c0_3, %c0_4] : memref<1x24xf32, #tpu.memory_space<vmem>>, vector<1x24xf32>
    %4 = vector.broadcast %3 : vector<1x24xf32> to vector<2x24xf32>
    %5 = arith.addf %2, %4 : vector<2x24xf32>
    %c0_5 = arith.constant 0 : index
    %c0_6 = arith.constant 0 : index
    %6 = vector.load %arg4[%c0_5, %c0_6] : memref<2x24xf32, #tpu.memory_space<vmem>>, vector<2x24xf32>
    tpu.vector_store %arg4[%c0_5, %c0_6], %5 {strides = array<i32>} : memref<2x24xf32, #tpu.memory_space<vmem>>, vector<2x24xf32>,
    return
  }
  func.func @transform_0(%arg0: i32) -> (i32, i32) {
    %c0_i32 = arith.constant 0 : i32
    %c0_i32_0 = arith.constant 0 : i32
    return %arg0, %c0_i32 : i32, i32
  }
  func.func @transform_1(%arg0: i32) -> (i32, i32) {
    %c0_i32 = arith.constant 0 : i32
    %c0_i32_0 = arith.constant 0 : i32
    %c0_i32_1 = arith.constant 0 : i32
    return %c0_i32, %c0_i32_0 : i32, i32
  }
  func.func @transform_2(%arg0: i32) -> (i32, i32) {
    %c0_i32 = arith.constant 0 : i32
    %c0_i32_0 = arith.constant 0 : i32
    %c0_i32_1 = arith.constant 0 : i32
    return %c0_i32, %c0_i32_0 : i32, i32
  }
  func.func @transform_3(%arg0: i32) -> (i32, i32) {
    %c0_i32 = arith.constant 0 : i32
    %c0_i32_0 = arith.constant 0 : i32
    return %arg0, %c0_i32 : i32, i32
  }
}

</mosaic_0001>

<bundles_post_ra>
// kernel: tpu_custom_call.1
= control target key start
LH: loop header
LB: loop body
LE: loop exit
PB: predicated region body
PF: predicated region fallthrough
CT: control target
= control target key end

     0   :  { %v2899_v16 = vmov 1983009808   ;;  %s4448_s0 = inlined_call_operand.vmem [shape: f32[2,540], index: 0, kind: input, shape index: {}]   ;;  %s4449_s1 = inlined_call_operand.vmem [shape: f32[540,24], index: 1, kind: input, shape index: {}]   ;;  %s4450_s2 = inlined_call_operand.vmem [shape: f32[1,24], index: 2, kind: input, shape index: {}]   ;;  %s4451_s3 = inlined_call_operand.hbm [shape: f32[2,24], index: 3, kind: output, shape index: {}]  }
   0x1   :  { %v48_v0 = vld [vmem:[%s4449_s1 + $0xf8] sm:$0xff]  ;;  %v47_v2 = vld [vmem:[%s4449_s1 + $0xf0] sm:$0xff]  ;;  %v46_v7 = vld [vmem:[%s4449_s1 + $0xe8] sm:$0xff]  ;;  %v2964_v17 = vunpack.c.l.s4 %v2899_v16 }
   0x2   :  { %v32_v1 = vld [vmem:[%s4449_s1 + $0x78] sm:$0xff]  ;;  %v2932_v3 = vand.u32 4294901760, %v48_v0  ;;  %v2936_v5 = vand.u32 4294901760, %v47_v2  ;;  %v31_v6 = vld [vmem:[%s4449_s1 + $0x70] sm:$0xff]  ;;  %v30_v8 = vld [vmem:[%s4449_s1 + $0x68] sm:$0xff]  ;;  %v2949_v11 = vand.u32 4294901760, %v46_v7 }
   0x3   :  { %v2934_v4 = vand.u32 4294901760, %v32_v1  ;;  %v2947_v10 = vand.u32 4294901760, %v31_v6  ;;  %v2951_v12 = vand.u32 4294901760, %v30_v8  ;;  %v45_v13 = vld [vmem:[%s4449_s1 + $0xe0] sm:$0xff]  ;;  %v2962_v15 = vld [vmem:[%s4449_s1 + $0xd8] sm:$0xff]  ;;  %v2985_v23 = vld [vmem:[%s4449_s1 + $0xd0] sm:$0xff] }
   0x4   :  { %v29_v14 = vld [vmem:[%s4449_s1 + $0x60] sm:$0xff]  ;;  %2356 = vmatprep.subr.mxu0 %v2932_v3  ;;  %v2967_v18 = vand.u32 4294901760, %v45_v13  ;;  %v2972_v20 = vand.u32 4294901760, %v2962_v15  ;;  %v2975_v21 = vsub.f32 %v48_v0, %v2932_v3  ;;  %v2980_v22 = vld [vmem:[%s4449_s1 + $0x58] sm:$0xff]  ;;  %v2990_v24 = vld [vmem:[%s4449_s1 + $0x50] sm:$0xff]  ;;  %v3000_v27 = vand.u32 4294901760, %v2985_v23 }
   0x5   :  { %v2969_v19 = vand.u32 4294901760, %v29_v14  ;;  %2357 = vmatpush3.msra.mxu0 %v2934_v4  ;;  %v2994_v25 = vand.u32 4294901760, %v2980_v22  ;;  %v2997_v26 = vsub.f32 %v32_v1, %v2934_v4  ;;  %v3003_v28 = vsub.f32 %v47_v2, %v2936_v5  ;;  %v3008_v29 = vld [vmem:[%s4449_s1 + $0xc8] sm:$0xff]  ;;  %v3018_v31 = vld [vmem:[%s4449_s1 + $0xc0] sm:$0xff]  ;;  %v3070_v49 = vld [vmem:[%s4449_s1 + $0xb8] sm:$0xff] }
   0x6   :  { %4595 = vst [vmem:[#allocation5_spill] sm:$0xff] %v2975_v21  ;;  %v3013_v30 = vld [vmem:[%s4449_s1 + $0x48] sm:$0xff]  ;;  %2358 = vmatprep.subr.mxu0 %v2936_v5  ;;  %v4464_v32 = vand.u32 4294901760, %v2975_v21  ;;  %v3023_v33 = vand.u32 4294901760, %v2990_v24  ;;  %v3026_v34 = vsub.f32 %v31_v6, %v2947_v10  ;;  %v3029_v35 = vand.u32 4294901760, %v3008_v29  ;;  %v3043_v40 = vld [vmem:[%s4449_s1 + $0x40] sm:$0xff] }
   0x7   :  { %2359 = vmatpush3.msra.mxu0 %v2947_v10  ;;  %v4463_v36 = vand.u32 4294901760, %v2997_v26  ;;  %v4461_v37 = vand.u32 4294901760, %v3003_v28  ;;  %v3035_v38 = vsub.f32 %v46_v7, %v2949_v11  ;;  %v3038_v39 = vand.u32 4294901760, %v3013_v30  ;;  %v3083_v54 = vld [vmem:[%s4449_s1 + $0x38] sm:$0xff]  ;;  %v3093_v59 = vld [vmem:[%s4449_s1 + $0xb0] sm:$0xff]  ;;  %v3260_v9 = vld [vmem:[%s4449_s1 + $0x88] sm:$0xff] }
   0x8   :  { %2360 = vmatprep.subr.mxu0 %v2949_v11  ;;  %v357_v41 = vsub.f32 %v2975_v21, %v4464_v32  ;;  %v4459_v42 = vand.u32 4294901760, %v3026_v34  ;;  %v3051_v43 = vsub.f32 %v30_v8, %v2951_v12  ;;  %v3054_v44 = vand.u32 4294901760, %v3018_v31  ;;  %v3108_v0 = vld [vmem:[%s4449_s1 + $0x30] sm:$0xff]  ;;  %v3124_v8 = vld [vmem:[%s4449_s1 + $0xa8] sm:$0xff] }
   0x9   :  { %2361 = vmatpush3.msra.mxu0 %v2951_v12  ;;  %v245_v45 = vsub.f32 %v2997_v26, %v4463_v36  ;;  %v364_v46 = vsub.f32 %v3003_v28, %v4461_v37  ;;  %v4458_v47 = vand.u32 4294901760, %v3035_v38  ;;  %v3065_v48 = vsub.f32 %v45_v13, %v2967_v18  ;;  %v3233_v37 = vld [vmem:[%s4449_s1 + $0x90] sm:$0xff] }
   0xa   :  { %4596 = vst [vmem:[#allocation6_spill] sm:$0xff] %v3054_v44  ;;  %2362 = vmatprep.subr.mxu0 %v2967_v18  ;;  %v358_v50 = vand.u32 4294901760, %v357_v41  ;;  %v252_v51 = vsub.f32 %v3026_v34, %v4459_v42  ;;  %v4456_v52 = vand.u32 4294901760, %v3051_v43  ;;  %v3078_v53 = vand.u32 4294901760, %v3043_v40  ;;  %v3138_v41 = vld [vmem:[%s4449_s1 + $0x28] sm:$0xff]  ;;  %v3217_v42 = vld [vmem:[%s4449_s1 + $0x18] sm:$0xff] }
   0xb   :  { %2363 = vmatpush3.msra.mxu0 %v2969_v19  ;;  %v246_v55 = vand.u32 4294901760, %v245_v45  ;;  %v365_v56 = vand.u32 4294901760, %v364_v46  ;;  %v371_v57 = vsub.f32 %v3035_v38, %v4458_v47  ;;  %v4454_v58 = vand.u32 4294901760, %v3065_v48 }
   0xc   :  { %4597 = vst [vmem:[#allocation7_spill] sm:$0xff] %v3078_v53  ;;  %2364 = vmatprep.subr.mxu0 %v2972_v20  ;;  %2391 = vmatprep.subr.mxu1 %v358_v50  ;;  %v253_v60 = vand.u32 4294901760, %v252_v51  ;;  %v259_v61 = vsub.f32 %v3051_v43, %v4456_v52  ;;  %v3100_v62 = vsub.f32 %v29_v14, %v2969_v19  ;;  %v3103_v63 = vand.u32 4294901760, %v3070_v49 }
   0xd   :  { %2365 = vmatpush3.msra.mxu0 %v2994_v25  ;;  %2392 = vmatpush3.msra.mxu1 %v246_v55  ;;  %v372_v1 = vand.u32 4294901760, %v371_v57  ;;  %v378_v2 = vsub.f32 %v3065_v48, %v4454_v58  ;;  %v3116_v6 = vsub.f32 %v2962_v15, %v2972_v20  ;;  %v3119_v7 = vand.u32 4294901760, %v3083_v54 }
   0xe   :  { %4598 = vst [vmem:[#allocation8_spill] sm:$0xff] %v3103_v63  ;;  %2366 = vmatprep.subr.mxu0 %v3000_v27  ;;  %2393 = vmatprep.subr.mxu1 %v365_v56  ;;  %v260_v13 = vand.u32 4294901760, %v259_v61  ;;  %v4452_v14 = vand.u32 4294901760, %v3100_v62  ;;  %v3130_v16 = vsub.f32 %v2980_v22, %v2994_v25  ;;  %v3133_v15 = vand.u32 4294901760, %v3093_v59 }
   0xf   :  { %4599 = vst [vmem:[#allocation9_spill] sm:$0xff] %v3119_v7  ;;  %2367 = vmatpush3.msra.mxu0 %v3023_v33  ;;  %2394 = vmatpush3.msra.mxu1 %v253_v60  ;;  %v379_v45 = vand.u32 4294901760, %v378_v2  ;;  %v4453_v46 = vand.u32 4294901760, %v3116_v6  ;;  %v3144_v50 = vsub.f32 %v2985_v23, %v3000_v27  ;;  %v3147_v22 = vand.u32 4294901760, %v3108_v0  ;;  %v3164_v23 = vld [vmem:[%s4449_s1 + $0xa0] sm:$0xff] }
  0x10   :  { %4600 = vst [vmem:[#allocation10_spill] sm:$0xff] %v3133_v15  ;;  %2368 = vmatprep.subr.mxu0 %v3029_v35  ;;  %2395 = vmatprep.subr.mxu1 %v372_v1  ;;  %v266_v51 = vsub.f32 %v3100_v62, %v4452_v14  ;;  %v4455_v55 = vand.u32 4294901760, %v3130_v16  ;;  %v3156_v56 = vsub.f32 %v2990_v24, %v3023_v33  ;;  %v3159_v57 = vand.u32 4294901760, %v3124_v8 }
  0x11   :  { %4601 = vst [vmem:[#allocation11_spill] sm:$0xff] %v3147_v22  ;;  %2369 = vmatpush3.msra.mxu0 %v3038_v39  ;;  %2396 = vmatpush3.msra.mxu1 %v260_v13  ;;  %v385_v60 = vsub.f32 %v3116_v6, %v4453_v46  ;;  %v4457_v61 = vand.u32 4294901760, %v3144_v50  ;;  %v3173_v24 = vsub.f32 %v3008_v29, %v3029_v35  ;;  %v3176_v1 = vand.u32 4294901760, %v3138_v41  ;;  %v3190_v29 = vld [vmem:[%s4449_s1 + $0x20] sm:$0xff] }
  0x12   :  { %4602 = vst [vmem:[#allocation12_spill] sm:$0xff] %v3159_v57  ;;  %2370 = vmatprep.subr.mxu0 %v3054_v44  ;;  %2397 = vmatprep.subr.mxu1 %v379_v45  ;;  %v267_v2 = vand.u32 4294901760, %v266_v51  ;;  %v273_v13 = vsub.f32 %v3130_v16, %v4455_v55  ;;  %v4460_v14 = vand.u32 4294901760, %v3156_v56  ;;  %v3185_v46 = vsub.f32 %v3013_v30, %v3038_v39  ;;  %v3203_v30 = vld [vmem:[%s4449_s1 + $0x98] sm:$0xff] }
  0x13   :  { %4603 = vst [vmem:[#allocation13_spill] sm:$0xff] %v3176_v1  ;;  %2371 = vmatpush3.msra.mxu0 %v3078_v53  ;;  %v386_v58 = vand.u32 4294901760, %v385_v60  ;;  %v392_v45 = vsub.f32 %v3144_v50, %v4457_v61  ;;  %v4462_v51 = vand.u32 4294901760, %v3173_v24  ;;  %v3198_v55 = vand.u32 4294901760, %v3164_v23 }
  0x14   :  { %2398 = vmatpush3.msra.mxu1 %v267_v2  ;;  %2372 = vmatprep.subr.mxu0 %v3103_v63  ;;  %v274_v52 = vand.u32 4294901760, %v273_v13  ;;  %v280_v60 = vsub.f32 %v3156_v56, %v4460_v14  ;;  %v4465_v61 = vand.u32 4294901760, %v3185_v46  ;;  %v3212_v47 = vsub.f32 %v3018_v31, %v3054_v44 }
  0x15   :  { %4604 = vst [vmem:[#allocation14_spill] sm:$0xff] %v3198_v55  ;;  %2399 = vmatprep.subr.mxu1 %v386_v58  ;;  %2373 = vmatpush3.msra.mxu0 %v3119_v7  ;;  %v393_v2 = vand.u32 4294901760, %v392_v45  ;;  %v399_v13 = vsub.f32 %v3173_v24, %v4462_v51  ;;  %v3224_v14 = vand.u32 4294901760, %v3190_v29  ;;  %v3228_v31 = vsub.f32 %v3043_v40, %v3078_v53  ;;  %v3246_v40 = vld [vmem:[%s4449_s1 + $0x10] sm:$0xff] }
  0x16   :  { %2400 = vmatpush3.msra.mxu1 %v274_v52  ;;  %2374 = vmatprep.subr.mxu0 %v3133_v15  ;;  %v281_v58 = vand.u32 4294901760, %v280_v60  ;;  %v287_v45 = vsub.f32 %v3185_v46, %v4465_v61  ;;  %v4470_v51 = vand.u32 4294901760, %v3212_v47  ;;  %v3241_v36 = vand.u32 4294901760, %v3203_v30 }
  0x17   :  { %4605 = vst [vmem:[#allocation15_spill] sm:$0xff] %v3224_v14  ;;  %4606 = vst [vmem:[#allocation16_spill] sm:$0xff] %v3228_v31  ;;  %2401 = vmatprep.subr.mxu1 %v393_v2  ;;  %2375 = vmatpush3.msra.mxu0 %v3147_v22  ;;  %v400_v52 = vand.u32 4294901760, %v399_v13  ;;  %v3252_v32 = vsub.f32 %v3070_v49, %v3103_v63  ;;  %v3255_v61 = vand.u32 4294901760, %v3217_v42 }
  0x18   :  { %4607 = vst [vmem:[#allocation17_spill] sm:$0xff] %v3241_v36 }
  0x19   :  { %4608 = vst [vmem:[#allocation18_spill] sm:$0xff] %v3255_v61 }
  0x1a   :  { %8 = vsyncpa [#allocation3], 0  ;;  %2402 = vmatpush3.msra.mxu1 %v281_v58  ;;  %2376 = vmatprep.subr.mxu0 %v3159_v57  ;;  %v288_v2 = vand.u32 4294901760, %v287_v45  ;;  %v406_v13 = vsub.f32 %v3212_v47, %v4470_v51  ;;  %v3268_v49 = vsub.f32 %v3083_v54, %v3119_v7  ;;  %v3271_v60 = vand.u32 4294901760, %v3233_v37  ;;  %v3288_v54 = vld [vmem:[%s4449_s1 + $0x8] sm:$0xff] }
  0x1b   :  { %2403 = vmatprep.subr.mxu1 %v400_v52  ;;  %2377 = vmatpush3.msra.mxu0 %v3176_v1  ;;  %v4611_v63 = vand.u32 4294901760, %v3228_v31  ;;  %v3280_v53 = vsub.f32 %v3093_v59, %v3133_v15  ;;  %v3283_v51 = vand.u32 4294901760, %v3246_v40  ;;  %v3294_v45 = vsub.f32 %v3108_v0, %v3147_v22  ;;  %v3302_v15 = vld [vmem:[%s4449_s1 + $0x80] sm:$0xff] }
  0x1c   :  { %4609 = vst [vmem:[#allocation19_spill] sm:$0xff] %v3268_v49  ;;  %4610 = vst [vmem:[#allocation20_spill] sm:$0xff] %v3271_v60  ;;  %2404 = vmatpush3.msra.mxu1 %v288_v2  ;;  %2378 = vmatprep.subr.mxu0 %v3198_v55  ;;  %v407_v52 = vand.u32 4294901760, %v406_v13  ;;  %v3297_v59 = vand.u32 4294901760, %v3260_v9  ;;  %v4615_v7 = vand.u32 4294901760, %v3252_v32  ;;  %v3311_v0 = vsub.f32 %v3124_v8, %v3159_v57  ;;  %v3328_v8 = vld [vmem:[%s4449_s1] sm:$0xff] }
  0x1d   :  { %v294_v58 = vsub.f32 %v3228_v31, %v4611_v63  ;;  %4612 = vst [vmem:[#allocation21_spill] sm:$0xff] %v3280_v53  ;;  %4613 = vst [vmem:[#allocation22_spill] sm:$0xff] %v3283_v51  ;;  %2379 = vmatpush3.msra.mxu0 %v3224_v14  ;;  %v4487_v63 = vand.u32 4294901760, %v3280_v53  ;;  %v4617_v22 = vand.u32 4294901760, %v3268_v49  ;;  %v3336_v57 = vand.u32 4294901760, %v3302_v15 }
  0x1e   :  { %4614 = vst [vmem:[#allocation23_spill] sm:$0xff] %v3297_v59  ;;  %v413_v13 = vsub.f32 %v3252_v32, %v4615_v7  ;;  %4616 = vst [vmem:[#allocation24_spill] sm:$0xff] %v3311_v0  ;;  %2405 = vmatprep.subr.mxu1 %v407_v52  ;;  %2380 = vmatprep.subr.mxu0 %v3241_v36  ;;  %v3323_v7 = vsub.f32 %v3138_v41, %v3176_v1  ;;  %v4492_v31 = vand.u32 4294901760, %v3311_v0  ;;  %vm125_vm0 = vcmask 1043456  }
  0x1f   :  { %v295_v2 = vand.u32 4294901760, %v294_v58  ;;  %v301_v44 = vsub.f32 %v3268_v49, %v4617_v22  ;;  %v3319_v58 = vand.u32 4294901760, %v3288_v54  ;;  %2381 = vmatpush3.msra.mxu0 %v3255_v61  ;;  %v420_v22 = vsub.f32 %v3280_v53, %v4487_v63 }
  0x20   :  { %v414_v52 = vand.u32 4294901760, %v413_v13  ;;  %2382 = vmatprep.subr.mxu0 %v3271_v60  ;;  %v4619_v1 = vand.u32 4294901760, %v3294_v45  ;;  %v3345_v13 = vsub.f32 %v3164_v23, %v3198_v55  ;;  %v3352_v53 = vand.u32 4294901760, %v3328_v8 }
  0x21   :  { %4618 = vst [vmem:[#allocation25_spill] sm:$0xff] %v3319_v58  ;;  %2406 = vmatpush3.msra.mxu1 %v295_v2  ;;  %v302_v41 = vand.u32 4294901760, %v301_v44  ;;  %v421_v63 = vand.u32 4294901760, %v420_v22  ;;  %2383 = vmatpush3.msra.mxu0 %v3283_v51  ;;  %v427_v44 = vsub.f32 %v3311_v0, %v4492_v31  ;;  %v4621_v23 = vand.u32 4294901760, %v3323_v7 }
  0x22   :  { %v308_v49 = vsub.f32 %v3294_v45, %v4619_v1  ;;  %2407 = vmatprep.subr.mxu1 %v414_v52  ;;  %4620 = vst [vmem:[#allocation26_spill] sm:$0xff] %v3352_v53  ;;  %v3356_v1 = vsub.f32 %v3190_v29, %v3224_v14  ;;  %2384 = vmatprep.subr.mxu0 %v3297_v59  ;;  %v4497_v22 = vand.u32 4294901760, %v3345_v13  ;;  %v97_v0 = vunpack.c.0.s8 %v2964_v17 }
  0x23   :  { %2408 = vmatpush3.msra.mxu1 %v302_v41  ;;  %v315_v52 = vsub.f32 %v3323_v7, %v4621_v23  ;;  %v428_v55 = vand.u32 4294901760, %v427_v44  ;;  %2385 = vmatpush3.msra.mxu0 %v3319_v58  ;;  %v4622_v29 = vlaneseq  ;;  %v3378_v44 = vsub.f32 %v3203_v30, %v3241_v36 }
  0x24   :  { %v309_v2 = vand.u32 4294901760, %v308_v49  ;;  %2409 = vmatprep.subr.mxu1 %v421_v63  ;;  %v4498_v31 = vand.u32 4294901760, %v3356_v1  ;;  %2386 = vmatprep.subr.mxu0 %v3336_v57  ;;  %v434_v41 = vsub.f32 %v3345_v13, %v4497_v22  ;;  %v3374_v63 = vld [vmem:[%s4448_s0] sm:$0xff]  ;;  %v3382_v17 = vsub.f32 %v3217_v42, %v3255_v61 }
  0x25   :  { %v99_v14 = vshrl.u32 %v4622_v29, 7  ;;  %v316_v49 = vand.u32 4294901760, %v315_v52  ;;  %2387 = vmatpush3.msra.mxu0 %v3352_v53  ;;  %v3392_v52 = vsub.f32 %v3233_v37, %v3271_v60  ;;  %v4499_v29 = vand.u32 4294901760, %v3378_v44 }
  0x26   :  { %2410 = vmatpush3.msra.mxu1 %v309_v2  ;;  %v322_v2 = vsub.f32 %v3356_v1, %v4498_v31  ;;  %v435_v30 = vand.u32 4294901760, %v434_v41  ;;  %2426 = vmatprep.subr.mxu0 %v2975_v21  ;;  %v4503_v42 = vand.u32 4294901760, %v3382_v17  ;;  %v3406_v37 = vsub.f32 %v3260_v9, %v3297_v59 }
  0x27   :  { %2411 = vmatprep.subr.mxu1 %v428_v55  ;;  %v3388_v23 = vsub.s32 %v97_v0, %v99_v14  ;;  %v3399_v55 = vsub.f32 %v3246_v40, %v3283_v51  ;;  %v4624_v9 = vand.u32 4294901760, %v3392_v52  ;;  %vm122_vm1 = vcmask 228352  }
  0x28   :  { %2412 = vmatpush3.msra.mxu1 %v316_v49  ;;  %v323_v22 = vand.u32 4294901760, %v322_v2  ;;  %v441_v49 = vsub.f32 %v3378_v44, %v4499_v29  ;;  %v329_v40 = vsub.f32 %v3382_v17, %v4503_v42  ;;  %v3417_v2 = vsub.f32 %v3288_v54, %v3319_v58 }
  0x29   :  { %v101_v14 = vrot.slane %v3374_v63, %v3388_v23  ;;  %2413 = vmatprep.subr.mxu1 %v435_v30  ;;  %v4510_v41 = vand.u32 4294901760, %v3399_v55  ;;  %v448_v30 = vsub.f32 %v3392_v52, %v4624_v9  ;;  %v4512_v29 = vand.u32 4294901760, %v3406_v37 }
  0x2a   :  { %2414 = vmatpush3.msra.mxu1 %v323_v22  ;;  %v442_v21 = vand.u32 4294901760, %v441_v49  ;;  %v330_v59 = vand.u32 4294901760, %v329_v40  ;;  %v4511_v51 = vand.u32 4294901760, %v3417_v2  ;;  %v3442_v40 = vsub.f32 %v3302_v15, %v3336_v57 }
  0x2b   :  { %v109_v31 = vcombine.high %v101_v14, %v101_v14  ;;  %v3419_v0 = vand.u32 4294901760, %v101_v14  ;;  %v336_v42 = vsub.f32 %v3399_v55, %v4510_v41  ;;  %v449_v58 = vand.u32 4294901760, %v448_v30 }
  0x2c   :  { %v455_v9 = vsub.f32 %v3406_v37, %v4512_v29  ;;  %2415 = vmatprep.subr.mxu1 %v442_v21  ;;  %v343_v49 = vsub.f32 %v3417_v2, %v4511_v51  ;;  %v3446_v41 = vsub.f32 %v3328_v8, %v3352_v53  ;;  %v4518_v51 = vand.u32 4294901760, %v3442_v40 }
  0x2d   :  { %4623 = vst [vmem:[#allocation27_spill] sm:$0xff] %v3419_v0  ;;  %v3429_v54 = vand.u32 4294901760, %v109_v31  ;;  %v3432_v22 = vsub.f32 %v101_v14, %v3419_v0  ;;  %v337_v60 = vand.u32 4294901760, %v336_v42  ;;  %2416 = vmatpush3.msra.mxu1 %v330_v59  ;;  %vm2901_vm2 = vmmov 0  }
  0x2e   :  { %4626 = vst [vmem:[#allocation29_spill] sm:$0xff] %v3446_v41  ;;  %v456_v21 = vand.u32 4294901760, %v455_v9  ;;  %2417 = vmatprep.subr.mxu1 %v449_v58  ;;  %v344_v42 = vand.u32 4294901760, %v343_v49  ;;  %v4517_v15 = vand.u32 4294901760, %v3446_v41  ;;  %vm2338_vm3 = vcmask 189440  }
  0x2f   :  { %4625 = vst [vmem:[#allocation28_spill] sm:$0xff] %v3429_v54  ;;  %v3449_v14 = vsub.f32 %v109_v31, %v3429_v54  ;;  %v4519_v30 = vand.u32 4294901760, %v3432_v22  ;;  %466 = vmatprep.mubr.f32.mxu1 %v3429_v54  ;;  %2418 = vmatpush3.msra.mxu1 %v337_v60  ;;  %v462_v31 = vsub.f32 %v3442_v40, %v4518_v51  ;;  %v4628_v60 = vld [vmem:[#allocation6_spill] sm:$0xff]  ;;  %v4638_v51 = vld [vmem:[#allocation13_spill] sm:$0xff] }
  0x30   :  { %2419 = vmatprep.subr.mxu1 %v456_v21  ;;  %v350_v59 = vsub.f32 %v3446_v41, %v4517_v15  ;;  %v4630_v21 = vld [vmem:[#allocation19_spill] sm:$0xff]  ;;  %v4637_v15 = vld [vmem:[#allocation12_spill] sm:$0xff] }
  0x31   :  { %v4520_v29 = vand.u32 4294901760, %v3449_v14  ;;  %v234_v8 = vsub.f32 %v3432_v22, %v4519_v30  ;;  %2420 = vmatpush3.msra.mxu1 %v344_v42  ;;  %v463_v49 = vand.u32 4294901760, %v462_v31  ;;  %v4631_v42 = vld [vmem:[#allocation8_spill] sm:$0xff]  ;;  %v4633_v31 = vld [vmem:[#allocation9_spill] sm:$0xff]  ;;  %v4639_v30 = vld [vmem:[#allocation14_spill] sm:$0xff] }
  0x32   :  { %v351_v54 = vand.u32 4294901760, %v350_v59  ;;  %v4634_v59 = vld [vmem:[#allocation10_spill] sm:$0xff] }
  0x33   :  { %v228_v58 = vsub.f32 %v3449_v14, %v4520_v29  ;;  %v235_v9 = vand.u32 4294901760, %v234_v8  ;;  %2421 = vmatprep.subr.mxu1 %v463_v49  ;;  %v4632_v8 = vld [vmem:[#allocation21_spill] sm:$0xff]  ;;  %v94_v49 = vcombine.high %v3374_v63, %v3374_v63  ;;  %v4640_v29 = vld [vmem:[#allocation15_spill] sm:$0xff] }
  0x34   :  { %2422 = vmatpush3.msra.mxu1 %v351_v54  ;;  %v4629_v54 = vld [vmem:[#allocation7_spill] sm:$0xff] }
  0x35   :  { %v229_v53 = vand.u32 4294901760, %v228_v58  ;;  %468 = vmatmul.mubr.f32.vlgmr.msra.gmra.mxu1 %v3419_v0  ;;  %2461 = vmatprep.subr.mxu1 %v2932_v3  ;;  %v4635_v58 = vld [vmem:[#allocation24_spill] sm:$0xff]  ;;  %v3522_v63 = vrot.slane %v94_v49, %v3388_v23  ;;  %v4644_v23 = vld [vmem:[#allocation23_spill] sm:$0xff]  ;;  %v4645_v49 = vld [vmem:[#allocation25_spill] sm:$0xff] }
  0x36   :  { %2462 = vmatpush3.msra.mxu1 %v2934_v4  ;;  %v4642_v0 = vld [vmem:[#allocation20_spill] sm:$0xff] }
  0x37   :  { %230 = vmatprep.mubr.f32.mxu0 %v229_v53  ;;  %2463 = vmatprep.subr.mxu1 %v2936_v5  ;;  %v4627_v53 = vld [vmem:[#allocation16_spill] sm:$0xff] }
  0x38   :  { %236 = vmatmul.mubr.f32.vlgmr.msra.gmra.mxu0 %v235_v9  ;;  %2464 = vmatpush3.msra.mxu1 %v2947_v10  ;;  %v4636_v9 = vld [vmem:[#allocation11_spill] sm:$0xff]  ;;  %4641 = vst [vmem:[#allocation16_spill] sm:$0xff] %v3522_v63  ;;  %v4646_v63 = vld [vmem:[#allocation5_spill] sm:$0xff] }
  0x39   :  { %2427 = vmatpush3.msra.mxu0 %v2997_v26  ;;  %2465 = vmatprep.subr.mxu1 %v2949_v11 }
  0x3a   :  { %2428 = vmatprep.subr.mxu0 %v3003_v28  ;;  %2466 = vmatpush3.msra.mxu1 %v2951_v12 }
  0x3b   :  { %2429 = vmatpush3.msra.mxu0 %v3026_v34  ;;  %2467 = vmatprep.subr.mxu1 %v2967_v18 }
  0x3c   :  { %2430 = vmatprep.subr.mxu0 %v3035_v38  ;;  %2468 = vmatpush3.msra.mxu1 %v2969_v19 }
  0x3d   :  { %2431 = vmatpush3.msra.mxu0 %v3051_v43  ;;  %2469 = vmatprep.subr.mxu1 %v2972_v20 }
  0x3e   :  { %2432 = vmatprep.subr.mxu0 %v3065_v48  ;;  %2470 = vmatpush3.msra.mxu1 %v2994_v25 }
  0x3f   :  { %2433 = vmatpush3.msra.mxu0 %v3100_v62  ;;  %2471 = vmatprep.subr.mxu1 %v3000_v27 }
  0x40   :  { %2434 = vmatprep.subr.mxu0 %v3116_v6  ;;  %2472 = vmatpush3.msra.mxu1 %v3023_v33 }
  0x41   :  { %2435 = vmatpush3.msra.mxu0 %v3130_v16  ;;  %2473 = vmatprep.subr.mxu1 %v3029_v35 }
  0x42   :  { %2436 = vmatprep.subr.mxu0 %v3144_v50  ;;  %2474 = vmatpush3.msra.mxu1 %v3038_v39 }
  0x43   :  { %2437 = vmatpush3.msra.mxu0 %v3156_v56  ;;  %2475 = vmatprep.subr.mxu1 %v4628_v60 }
  0x44   :  { %2438 = vmatprep.subr.mxu0 %v3173_v24  ;;  %2476 = vmatpush3.msra.mxu1 %v4629_v54 }
  0x45   :  { %2439 = vmatpush3.msra.mxu0 %v3185_v46  ;;  %2477 = vmatprep.subr.mxu1 %v4631_v42 }
  0x46   :  { %2440 = vmatprep.subr.mxu0 %v3212_v47  ;;  %2478 = vmatpush3.msra.mxu1 %v4633_v31 }
  0x47   :  { %2441 = vmatpush3.msra.mxu0 %v4627_v53  ;;  %2479 = vmatprep.subr.mxu1 %v4634_v59 }
  0x48   :  { %2442 = vmatprep.subr.mxu0 %v3252_v32  ;;  %2480 = vmatpush3.msra.mxu1 %v4636_v9 }
  0x49   :  { %2443 = vmatpush3.msra.mxu0 %v4630_v21  ;;  %2481 = vmatprep.subr.mxu1 %v4637_v15 }
  0x4a   :  { %2444 = vmatprep.subr.mxu0 %v4632_v8  ;;  %2482 = vmatpush3.msra.mxu1 %v4638_v51 }
  0x4b   :  { %2445 = vmatpush3.msra.mxu0 %v3294_v45  ;;  %2483 = vmatprep.subr.mxu1 %v4639_v30  ;;  %v4643_v30 = vld [vmem:[#allocation22_spill] sm:$0xff] }
  0x4c   :  { %2446 = vmatprep.subr.mxu0 %v4635_v58  ;;  %603 = vmatprep.mubr.f32.mxu0 %v3449_v14 }
  0x4d   :  { %2447 = vmatpush3.msra.mxu0 %v3323_v7  ;;  %2484 = vmatpush3.msra.mxu1 %v4640_v29 }
  0x4e   :  { %2448 = vmatprep.subr.mxu0 %v3345_v13  ;;  %2485 = vmatprep.subr.mxu1 %v3241_v36  ;;  %v4648_v36 = vand.u32 4294901760, %v2997_v26  ;;  %v4655_v26 = vand.u32 4294901760, %v3051_v43  ;;  %v4664_v43 = vand.u32 4294901760, %v3212_v47 }
  0x4f   :  { %2449 = vmatpush3.msra.mxu0 %v3356_v1  ;;  %2486 = vmatpush3.msra.mxu1 %v3255_v61  ;;  %v4647_v61 = vand.u32 4294901760, %v4646_v63 }
  0x50   :  { %2450 = vmatprep.subr.mxu0 %v3378_v44  ;;  %2487 = vmatprep.subr.mxu1 %v4642_v0  ;;  %v4650_v0 = vld [vmem:[#allocation26_spill] sm:$0xff] }
  0x51   :  { %2451 = vmatpush3.msra.mxu0 %v3382_v17  ;;  %2488 = vmatpush3.msra.mxu1 %v4643_v30  ;;  %v4649_v30 = vand.u32 4294901760, %v3003_v28  ;;  %v4656_v28 = vand.u32 4294901760, %v3065_v48 }
  0x52   :  { %2452 = vmatprep.subr.mxu0 %v3392_v52  ;;  %2489 = vmatprep.subr.mxu1 %v4644_v23  ;;  %v4651_v23 = vand.u32 4294901760, %v3026_v34  ;;  %v4657_v34 = vand.u32 4294901760, %v3100_v62  ;;  %v4665_v62 = vand.u32 4294901760, %v4627_v53 }
  0x53   :  { %2453 = vmatpush3.msra.mxu0 %v3399_v55  ;;  %2490 = vmatpush3.msra.mxu1 %v4645_v49  ;;  %v4652_v49 = vand.u32 4294901760, %v3449_v14  ;;  %v4672_v14 = vand.u32 4294901760, %v4635_v58  ;;  %v4678_v58 = vand.u32 4294901760, %v3356_v1  ;;  %v4679_v1 = vand.u32 4294901760, %v3378_v44  ;;  %v58_v44 = vld [vmem:[%s4449_s1 + $0x148] sm:$0xff] }
  0x54   :  { %2454 = vmatprep.subr.mxu0 %v3406_v37  ;;  %2491 = vmatprep.subr.mxu1 %v3336_v57 }
  0x55   :  { %2455 = vmatpush3.msra.mxu0 %v3417_v2  ;;  %2492 = vmatpush3.msra.mxu1 %v4650_v0 }
  0x56   :  { %2456 = vmatprep.subr.mxu0 %v3442_v40  ;;  %710 = vmatprep.mubr.f32.mxu1 %v4652_v49 }
  0x57   :  { %2457 = vmatpush3.msra.mxu0 %v3446_v41  ;;  %v4653_v41 = vand.u32 4294901760, %v3035_v38  ;;  %2531 = vmatprep.subr.mxu1 %v2932_v3  ;;  %v4659_v38 = vand.u32 4294901760, %v3130_v16  ;;  %v4660_v3 = vand.u32 4294901760, %v3144_v50  ;;  %v62_v16 = vld [vmem:[%s4449_s1 + $0x168] sm:$0xff]  ;;  %v77_v50 = vld [vmem:[%s4449_s1 + $0x1e0] sm:$0xff] }
  0x58   :  { %606 = vmatmul.mubr.f32.vlgmr.msra.gmra.mxu0 %v3432_v22  ;;  %2496 = vmatprep.subr.mxu0 %v4647_v61  ;;  %v4654_v61 = vand.u32 4294901760, %v3432_v22  ;;  %v3652_v53 = vand.u32 4294901760, %v77_v50 }
  0x59   :  { %2497 = vmatpush3.msra.mxu0 %v4648_v36  ;;  %v4658_v36 = vand.u32 4294901760, %v3116_v6  ;;  %v4666_v6 = vand.u32 4294901760, %v3252_v32  ;;  %v4668_v32 = vand.u32 4294901760, %v4632_v8 }
  0x5a   :  { %2498 = vmatprep.subr.mxu0 %v4649_v30  ;;  %714 = vmatmul.mubr.f32.vlgmr.msra.gmra.mxu1 %v4654_v61  ;;  %v4673_v30 = vand.u32 4294901760, %v3323_v7  ;;  %4674 = vst [vmem:[#allocation19_spill] sm:$0xff] %v3652_v53 }
  0x5b   :  { %2499 = vmatpush3.msra.mxu0 %v4651_v23  ;;  %2532 = vmatpush3.msra.mxu1 %v2934_v4  ;;  %v4661_v4 = vand.u32 4294901760, %v3156_v56  ;;  %v61_v56 = vld [vmem:[%s4449_s1 + $0x160] sm:$0xff] }
  0x5c   :  { %2500 = vmatprep.subr.mxu0 %v4653_v41  ;;  %2533 = vmatprep.subr.mxu1 %v2936_v5  ;;  %v64_v5 = vld [vmem:[%s4449_s1 + $0x178] sm:$0xff]  ;;  %v3635_v41 = vand.u32 4294901760, %v62_v16 }
  0x5d   :  { %2501 = vmatpush3.msra.mxu0 %v4655_v26  ;;  %2534 = vmatpush3.msra.mxu1 %v2947_v10  ;;  %v4662_v10 = vand.u32 4294901760, %v3173_v24  ;;  %v3592_v48 = vand.u32 4294901760, %v64_v5  ;;  %v4681_v26 = vand.u32 4294901760, %v3382_v17 }
  0x5e   :  { %2502 = vmatprep.subr.mxu0 %v4656_v28  ;;  %2535 = vmatprep.subr.mxu1 %v2949_v11  ;;  %v80_v11 = vld [vmem:[%s4449_s1 + $0x1f8] sm:$0xff]  ;;  %4671 = vst [vmem:[#allocation7_spill] sm:$0xff] %v3635_v41  ;;  %v3672_v63 = vsub.f32 %v62_v16, %v3635_v41 }
  0x5f   :  { %2503 = vmatpush3.msra.mxu0 %v4657_v34  ;;  %2536 = vmatpush3.msra.mxu1 %v2951_v12  ;;  %v4663_v12 = vand.u32 4294901760, %v3185_v46  ;;  %v4667_v46 = vand.u32 4294901760, %v4630_v21  ;;  %v60_v21 = vld [vmem:[%s4449_s1 + $0x158] sm:$0xff] }
  0x60   :  { %2504 = vmatprep.subr.mxu0 %v4658_v36  ;;  %2537 = vmatprep.subr.mxu1 %v2967_v18  ;;  %v63_v18 = vld [vmem:[%s4449_s1 + $0x170] sm:$0xff]  ;;  %v4682_v36 = vand.u32 4294901760, %v3392_v52  ;;  %v4685_v52 = vand.u32 4294901760, %v3399_v55 }
  0x61   :  { %2505 = vmatpush3.msra.mxu0 %v4659_v38  ;;  %2538 = vmatpush3.msra.mxu1 %v2969_v19  ;;  %v79_v19 = vld [vmem:[%s4449_s1 + $0x1f0] sm:$0xff]  ;;  %v3605_v47 = vand.u32 4294901760, %v63_v18 }
  0x62   :  { %2506 = vmatprep.subr.mxu0 %v4660_v3  ;;  %2539 = vmatprep.subr.mxu1 %v2972_v20  ;;  %v3600_v20 = vand.u32 4294901760, %v80_v11  ;;  %v74_v3 = vld [vmem:[%s4449_s1 + $0x1c8] sm:$0xff] }
  0x63   :  { %2507 = vmatpush3.msra.mxu0 %v4661_v4  ;;  %2540 = vmatpush3.msra.mxu1 %v2994_v25  ;;  %v78_v25 = vld [vmem:[%s4449_s1 + $0x1e8] sm:$0xff] }
  0x64   :  { %2508 = vmatprep.subr.mxu0 %v4662_v10  ;;  %2541 = vmatprep.subr.mxu1 %v3000_v27  ;;  %v3616_v27 = vand.u32 4294901760, %v79_v19  ;;  %v3633_v24 = vand.u32 4294901760, %v78_v25  ;;  %v3641_v22 = vsub.f32 %v80_v11, %v3600_v20  ;;  %v4529_v11 = vand.u32 4294901760, %v3672_v63 }
  0x65   :  { %2509 = vmatpush3.msra.mxu0 %v4663_v12  ;;  %2542 = vmatpush3.msra.mxu1 %v3023_v33  ;;  %v3622_v33 = vsub.f32 %v64_v5, %v3592_v48  ;;  %v4687_v12 = vand.u32 4294901760, %v3406_v37 }
  0x66   :  { %2510 = vmatprep.subr.mxu0 %v4664_v43  ;;  %2543 = vmatprep.subr.mxu1 %v3029_v35  ;;  %v4669_v35 = vand.u32 4294901760, %v3294_v45  ;;  %4670 = vst [vmem:[#allocation6_spill] sm:$0xff] %v3633_v24  ;;  %v3647_v45 = vsub.f32 %v63_v18, %v3605_v47  ;;  %v3660_v8 = vsub.f32 %v79_v19, %v3616_v27  ;;  %v4535_v23 = vand.u32 4294901760, %v3641_v22  ;;  %v4688_v18 = vld [vmem:[#allocation28_spill] sm:$0xff] }
  0x67   :  { %2511 = vmatpush3.msra.mxu0 %v4665_v62  ;;  %2544 = vmatpush3.msra.mxu1 %v3038_v39  ;;  %v76_v39 = vld [vmem:[%s4449_s1 + $0x1d8] sm:$0xff]  ;;  %v3682_v49 = vsub.f32 %v78_v25, %v3633_v24  ;;  %v3742_v19 = vand.u32 4294901760, %v58_v44  ;;  %v73_v62 = vld [vmem:[%s4449_s1 + $0x1c0] sm:$0xff]  ;;  %v3755_v25 = vand.u32 4294901760, %v74_v3 }
  0x68   :  { %2512 = vmatprep.subr.mxu0 %v4666_v6  ;;  %2545 = vmatprep.subr.mxu1 %v4628_v60  ;;  %v3654_v60 = vand.u32 4294901760, %v61_v56  ;;  %v3665_v7 = vand.u32 4294901760, %v76_v39  ;;  %v4531_v61 = vand.u32 4294901760, %v3647_v45  ;;  %v4532_v34 = vand.u32 4294901760, %v3660_v8 }
  0x69   :  { %2513 = vmatpush3.msra.mxu0 %v4667_v46  ;;  %2546 = vmatpush3.msra.mxu1 %v4629_v54  ;;  %v4676_v54 = vand.u32 4294901760, %v3345_v13  ;;  %v75_v13 = vld [vmem:[%s4449_s1 + $0x1d0] sm:$0xff]  ;;  %v3727_v5 = vsub.f32 %v3641_v22, %v4535_v23  ;;  %v4530_v10 = vand.u32 4294901760, %v3682_v49  ;;  %4689 = vst [vmem:[#allocation11_spill] sm:$0xff] %v3742_v19  ;;  %v4690_v6 = vand.u32 4294901760, %v3417_v2  ;;  %4691 = vst [vmem:[#allocation12_spill] sm:$0xff] %v3755_v25 }
  0x6a   :  { %2514 = vmatprep.subr.mxu0 %v4668_v32  ;;  %2547 = vmatprep.subr.mxu1 %v4631_v42  ;;  %4675 = vst [vmem:[#allocation8_spill] sm:$0xff] %v3654_v60  ;;  %4677 = vst [vmem:[#allocation21_spill] sm:$0xff] %v3665_v7  ;;  %v4534_v42 = vand.u32 4294901760, %v3622_v33  ;;  %v3694_v28 = vsub.f32 %v61_v56, %v3654_v60  ;;  %v3719_v4 = vsub.f32 %v76_v39, %v3665_v7  ;;  %v57_v46 = vld [vmem:[%s4449_s1 + $0x140] sm:$0xff]  ;;  %v56_v2 = vld [vmem:[%s4449_s1 + $0x138] sm:$0xff] }
  0x6b   :  { %2515 = vmatpush3.msra.mxu0 %v4669_v35  ;;  %2548 = vmatpush3.msra.mxu1 %v4633_v31  ;;  %v59_v31 = vld [vmem:[%s4449_s1 + $0x150] sm:$0xff]  ;;  %v3740_v55 = vsub.f32 %v3647_v45, %v4531_v61  ;;  %v3753_v37 = vsub.f32 %v3660_v8, %v4532_v34 }
  0x6c   :  { %2516 = vmatprep.subr.mxu0 %v4672_v14  ;;  %2549 = vmatprep.subr.mxu1 %v4634_v59  ;;  %v3687_v59 = vand.u32 4294901760, %v60_v21  ;;  %v3709_v17 = vsub.f32 %v3622_v33, %v4534_v42  ;;  %v3713_v38 = vand.u32 4294901760, %v59_v31  ;;  %v4528_v32 = vand.u32 4294901760, %v3694_v28  ;;  %v4705_v61 = vld [vmem:[#allocation23_spill] sm:$0xff]  ;;  %v3846_v42 = vld [vmem:[%s4449_s1 + $0x1a8] sm:$0xff] }
  0x6d   :  { %2517 = vmatpush3.msra.mxu0 %v4673_v30  ;;  %2550 = vmatpush3.msra.mxu1 %v4636_v9  ;;  %v3701_v9 = vsub.f32 %v77_v50, %v3652_v53  ;;  %v4693_v50 = vld [vmem:[#allocation17_spill] sm:$0xff]  ;;  %v4533_v39 = vand.u32 4294901760, %v3719_v4 }
  0x6e   :  { %2518 = vmatprep.subr.mxu0 %v4676_v54  ;;  %4680 = vst [vmem:[#allocation9_spill] sm:$0xff] %v3687_v59  ;;  %2551 = vmatprep.subr.mxu1 %v4637_v15  ;;  %v3711_v15 = vand.u32 4294901760, %v75_v13  ;;  %4684 = vst [vmem:[#allocation24_spill] sm:$0xff] %v3713_v38  ;;  %v3735_v43 = vsub.f32 %v60_v21, %v3687_v59  ;;  %v3770_v35 = vsub.f32 %v59_v31, %v3713_v38  ;;  %v4694_v30 = vld [vmem:[#allocation29_spill] sm:$0xff]  ;;  %v4696_v54 = vld [vmem:[#allocation18_spill] sm:$0xff] }
  0x6f   :  { %2519 = vmatpush3.msra.mxu0 %v4678_v58  ;;  %2552 = vmatpush3.msra.mxu1 %v4638_v51  ;;  %v4686_v51 = vld [vmem:[#allocation14_spill] sm:$0xff]  ;;  %v4527_v16 = vand.u32 4294901760, %v3701_v9  ;;  %v4695_v21 = vand.u32 4294901760, %v4694_v30  ;;  %v3783_v58 = vsub.f32 %v3682_v49, %v4530_v10  ;;  %v3788_v31 = vsub.f32 %v3672_v63, %v4529_v11 }
  0x70   :  { %2520 = vmatprep.subr.mxu0 %v4679_v1  ;;  %4683 = vst [vmem:[#allocation10_spill] sm:$0xff] %v3711_v15  ;;  %2553 = vmatprep.subr.mxu1 %v4686_v51  ;;  %v3774_v14 = vsub.f32 %v75_v13, %v3711_v15  ;;  %v3790_v1 = vand.u32 4294901760, %v73_v62  ;;  %v72_v13 = vld [vmem:[%s4449_s1 + $0x1b8] sm:$0xff]  ;;  %v3801_v51 = vand.u32 4294901760, %v57_v46  ;;  %v4536_v30 = vand.u32 4294901760, %v3735_v43  ;;  %v55_v11 = vld [vmem:[%s4449_s1 + $0x130] sm:$0xff] }
  0x71   :  { %2521 = vmatpush3.msra.mxu0 %v4681_v26  ;;  %880 = vmatprep.mubr.f32.mxu0 %v4688_v18  ;;  %v4698_v26 = vld [vmem:[#allocation27_spill] sm:$0xff]  ;;  %v3836_v10 = vsub.f32 %v74_v3, %v3755_v25  ;;  %v4707_v3 = vld [vmem:[#allocation25_spill] sm:$0xff]  ;;  %v3877_v56 = vand.u32 4294901760, %v55_v11 }
  0x72   :  { %2522 = vmatprep.subr.mxu0 %v4682_v36  ;;  %2554 = vmatpush3.msra.mxu1 %v4640_v29  ;;  %v4692_v29 = vand.u32 4294901760, %v3442_v40  ;;  %4697 = vst [vmem:[#allocation13_spill] sm:$0xff] %v3790_v1  ;;  %4700 = vst [vmem:[#allocation5_spill] sm:$0xff] %v3801_v51  ;;  %v3849_v23 = vsub.f32 %v73_v62, %v3790_v1  ;;  %v54_v36 = vld [vmem:[%s4449_s1 + $0x128] sm:$0xff]  ;;  %v53_v62 = vld [vmem:[%s4449_s1 + $0x120] sm:$0xff] }
  0x73   :  { %2523 = vmatpush3.msra.mxu0 %v4685_v52  ;;  %2555 = vmatprep.subr.mxu1 %v4693_v50  ;;  %v3799_v52 = vsub.f32 %v58_v44, %v3742_v19  ;;  %v3811_v50 = vsub.f32 %v3701_v9, %v4527_v16  ;;  %v3816_v44 = vsub.f32 %v3694_v28, %v4528_v32  ;;  %v4537_v32 = vand.u32 4294901760, %v3774_v14  ;;  %v4715_v40 = vld [vmem:[#allocation16_spill] sm:$0xff] }
  0x74   :  { %2524 = vmatprep.subr.mxu0 %v4687_v12  ;;  %2556 = vmatpush3.msra.mxu1 %v4696_v54  ;;  %v3803_v12 = vand.u32 4294901760, %v56_v2  ;;  %v4703_v54 = vld [vmem:[#allocation22_spill] sm:$0xff]  ;;  %v3829_v16 = vsub.f32 %v3719_v4, %v4533_v39  ;;  %v4540_v39 = vand.u32 4294901760, %v3770_v35  ;;  %4706 = vst [vmem:[#allocation28_spill] sm:$0xff] %v3849_v23 }
  0x75   :  { %2525 = vmatpush3.msra.mxu0 %v4690_v6  ;;  %4699 = vst [vmem:[#allocation15_spill] sm:$0xff] %v3799_v52  ;;  %v4702_v6 = vld [vmem:[#allocation20_spill] sm:$0xff]  ;;  %984 = vmatprep.mubr.f32.mxu1 %v4688_v18  ;;  %v4714_v18 = vand.u32 4294901760, %v3799_v52 }
  0x76   :  { %2526 = vmatprep.subr.mxu0 %v4692_v29  ;;  %4701 = vst [vmem:[#allocation26_spill] sm:$0xff] %v3803_v12  ;;  %2557 = vmatprep.subr.mxu1 %v4702_v6  ;;  %v3824_v6 = vand.u32 4294901760, %v72_v13  ;;  %v3904_v29 = vand.u32 4294901760, %v53_v62 }
  0x77   :  { %2527 = vmatpush3.msra.mxu0 %v4695_v21  ;;  %v71_v21 = vld [vmem:[%s4449_s1 + $0x1b0] sm:$0xff]  ;;  %2558 = vmatpush3.msra.mxu1 %v4703_v54  ;;  %v3857_v54 = vsub.f32 %v56_v2, %v3803_v12  ;;  %v3888_v2 = vand.u32 4294901760, %v3846_v42 }
  0x78   :  { %882 = vmatmul.mubr.f32.vlgmr.msra.gmra.mxu0 %v4698_v26  ;;  %2566 = vmatprep.subr.mxu0 %v3600_v20  ;;  %4704 = vst [vmem:[#allocation14_spill] sm:$0xff] %v3824_v6  ;;  %v3859_v34 = vand.u32 4294901760, %v71_v21  ;;  %4713 = vst [vmem:[#allocation22_spill] sm:$0xff] %v3904_v29 }
  0x79   :  { %2567 = vmatpush3.msra.mxu0 %v3592_v48  ;;  %2559 = vmatprep.subr.mxu1 %v4705_v61  ;;  %v3854_v61 = vsub.f32 %v57_v46, %v3801_v51  ;;  %4709 = vst [vmem:[#allocation29_spill] sm:$0xff] %v3857_v54  ;;  %4711 = vst [vmem:[#allocation27_spill] sm:$0xff] %v3888_v2  ;;  %v52_v46 = vld [vmem:[%s4449_s1 + $0x118] sm:$0xff] }
  0x7a   :  { %2568 = vmatprep.subr.mxu0 %v3616_v27  ;;  %2560 = vmatpush3.msra.mxu1 %v4707_v3  ;;  %4710 = vst [vmem:[#allocation18_spill] sm:$0xff] %v3859_v34  ;;  %v3875_v3 = vsub.f32 %v3735_v43, %v4536_v30  ;;  %v69_v30 = vld [vmem:[%s4449_s1 + $0x1a0] sm:$0xff] }
  0x7b   :  { %2569 = vmatpush3.msra.mxu0 %v3605_v47  ;;  %4708 = vst [vmem:[#allocation17_spill] sm:$0xff] %v3854_v61  ;;  %2561 = vmatprep.subr.mxu1 %v3336_v57  ;;  %v3885_v57 = vsub.f32 %v3774_v14, %v4537_v32  ;;  %v3901_v32 = vand.u32 4294901760, %v54_v36 }
  0x7c   :  { %2570 = vmatprep.subr.mxu0 %v3633_v24  ;;  %2562 = vmatpush3.msra.mxu1 %v4650_v0  ;;  %v3899_v0 = vsub.f32 %v3770_v35, %v4540_v39  ;;  %v4716_v24 = vand.u32 4294901760, %v3727_v5  ;;  %v3947_v39 = vsub.f32 %v71_v21, %v3859_v34  ;;  %v4722_v21 = vand.u32 4294901760, %v3740_v55 }
  0x7d   :  { %2571 = vmatpush3.msra.mxu0 %v3635_v41  ;;  %4712 = vst [vmem:[#allocation20_spill] sm:$0xff] %v3901_v32  ;;  %986 = vmatmul.mubr.f32.vlgmr.msra.gmra.mxu1 %v4698_v26  ;;  %v110_v41 = vcombine.high %v4715_v40, %v4715_v40  ;;  %v1136_v26 = vand.u32 4294901760, %v3875_v3  ;;  %v3944_v3 = vand.u32 4294901760, %v52_v46  ;;  %v4725_v55 = vand.u32 4294901760, %v3783_v58 }
  0x7e   :  { %2572 = vmatprep.subr.mxu0 %v3652_v53  ;;  %v3918_v53 = vsub.f32 %v72_v13, %v3824_v6  ;;  %2601 = vmatprep.subr.mxu1 %v4716_v24  ;;  %v4717_v13 = vand.u32 4294901760, %v3709_v17  ;;  %v4718_v24 = vand.u32 4294901760, %v3836_v10  ;;  %v4720_v17 = vand.u32 4294901760, %v3753_v37  ;;  %v51_v37 = vld [vmem:[%s4449_s1 + $0x110] sm:$0xff] }
  0x7f   :  { %2573 = vmatpush3.msra.mxu0 %v3654_v60  ;;  %v3914_v60 = vsub.f32 %v3799_v52, %v4714_v18  ;;  %v3929_v18 = vand.u32 4294901760, %v69_v30  ;;  %v1255_v52 = vand.u32 4294901760, %v3885_v57  ;;  %4719 = vst [vmem:[#allocation23_spill] sm:$0xff] %v3944_v3  ;;  %v1143_v57 = vand.u32 4294901760, %v3899_v0 }
  0x80   :  { %2574 = vmatprep.subr.mxu0 %v3665_v7  ;;  %v3927_v7 = vsub.f32 %v55_v11, %v3877_v56  ;;  %2602 = vmatpush3.msra.mxu1 %v4717_v13  ;;  %v3939_v5 = vsub.f32 %v3836_v10, %v4718_v24  ;;  %v68_v11 = vld [vmem:[%s4449_s1 + $0x198] sm:$0xff]  ;;  %v3954_v13 = vsub.f32 %v54_v36, %v3901_v32  ;;  %v4721_v24 = vand.u32 4294901760, %v3849_v23 }
  0x81   :  { %2575 = vmatpush3.msra.mxu0 %v3687_v59  ;;  %2603 = vmatprep.subr.mxu1 %v4720_v17  ;;  %v3962_v59 = vsub.f32 %v53_v62, %v3904_v29  ;;  %v4723_v0 = vand.u32 4294901760, %v3854_v61  ;;  %v67_v62 = vld [vmem:[%s4449_s1 + $0x190] sm:$0xff]  ;;  %v4727_v36 = vand.u32 4294901760, %v3857_v54  ;;  %v4000_v58 = vand.u32 4294901760, %v4715_v40 }
  0x82   :  { %2576 = vmatprep.subr.mxu0 %v3711_v15  ;;  %v3959_v15 = vsub.f32 %v3849_v23, %v4721_v24  ;;  %2604 = vmatpush3.msra.mxu1 %v4722_v21  ;;  %v3985_v21 = vand.u32 4294901760, %v68_v11  ;;  %v66_v24 = vld [vmem:[%s4449_s1 + $0x188] sm:$0xff] }
  0x83   :  { %2577 = vmatpush3.msra.mxu0 %v3713_v38  ;;  %v3974_v17 = vsub.f32 %v3854_v61, %v4723_v0  ;;  %v3980_v38 = vand.u32 4294901760, %v110_v41  ;;  %2605 = vmatprep.subr.mxu1 %v4725_v55  ;;  %v3990_v0 = vsub.f32 %v3857_v54, %v4727_v36  ;;  %4728 = vst [vmem:[#allocation30_spill] sm:$0xff] %v4000_v58  ;;  %v4729_v55 = vand.u32 4294901760, %v3788_v31 }
  0x84   :  { %2578 = vmatprep.subr.mxu0 %v3755_v25  ;;  %4726 = vst [vmem:[#allocation16_spill] sm:$0xff] %v3985_v21  ;;  %v3997_v25 = vsub.f32 %v3846_v42, %v3888_v2  ;;  %v4007_v36 = vsub.f32 %v52_v46, %v3944_v3  ;;  %v4010_v61 = vand.u32 4294901760, %v51_v37  ;;  %v4730_v42 = vand.u32 4294901760, %v3811_v50  ;;  %v50_v46 = vld [vmem:[%s4449_s1 + $0x108] sm:$0xff] }
  0x85   :  { %4724 = vst [vmem:[#allocation25_spill] sm:$0xff] %v3980_v38  ;;  %2579 = vmatpush3.msra.mxu0 %v3742_v19  ;;  %2606 = vmatpush3.msra.mxu1 %v4729_v55  ;;  %v1262_v19 = vand.u32 4294901760, %v3939_v5  ;;  %v1269_v23 = vand.u32 4294901760, %v3959_v15  ;;  %v4016_v31 = vand.u32 4294901760, %v67_v62  ;;  %v4023_v5 = vsub.f32 %v69_v30, %v3929_v18  ;;  %v65_v55 = vld [vmem:[%s4449_s1 + $0x180] sm:$0xff] }
  0x86   :  { %2580 = vmatprep.subr.mxu0 %v3790_v1  ;;  %2607 = vmatprep.subr.mxu1 %v4730_v42  ;;  %v4732_v54 = vand.u32 4294901760, %v3816_v44  ;;  %v1157_v50 = vand.u32 4294901760, %v3974_v17  ;;  %v4733_v15 = vand.u32 4294901760, %v3918_v53  ;;  %v4038_v30 = vsub.f32 %v110_v41, %v3980_v38 }
  0x87   :  { %2581 = vmatpush3.msra.mxu0 %v3801_v51  ;;  %4731 = vst [vmem:[#allocation31_spill] sm:$0xff] %v4016_v31  ;;  %v4032_v51 = vand.u32 4294901760, %v66_v24  ;;  %v4734_v44 = vand.u32 4294901760, %v3829_v16  ;;  %v4053_v41 = vsub.f32 %v68_v11, %v3985_v21  ;;  %v4735_v16 = vand.u32 4294901760, %v3947_v39  ;;  %1328 = vmatprep.mubr.f32.mxu1 %v3980_v38 }
  0x88   :  { %2608 = vmatpush3.msra.mxu1 %v4732_v54  ;;  %2582 = vmatprep.subr.mxu0 %v3824_v6  ;;  %v1275_v42 = vsub.f32 %v3918_v53, %v4733_v15  ;;  %v1164_v54 = vand.u32 4294901760, %v3990_v0  ;;  %v49_v15 = vld [vmem:[%s4449_s1 + $0x100] sm:$0xff]  ;;  %v4050_v6 = vsub.f32 %v4715_v40, %v4000_v58  ;;  %v4062_v17 = vand.u32 4294901760, %v50_v46 }
  0x89   :  { %2609 = vmatprep.subr.mxu1 %v4734_v44  ;;  %2583 = vmatpush3.msra.mxu0 %v3803_v12  ;;  %v1282_v0 = vsub.f32 %v3947_v39, %v4735_v16  ;;  %v4060_v44 = vsub.f32 %v51_v37, %v4010_v61  ;;  %v4736_v40 = vand.u32 4294901760, %v3927_v7  ;;  %v4069_v11 = vand.u32 4294901760, %v65_v55 }
  0x8a   :  { %2610 = vmatpush3.msra.mxu1 %v1136_v26  ;;  %2584 = vmatprep.subr.mxu0 %v3859_v34  ;;  %v4073_v16 = vsub.f32 %v67_v62, %v4016_v31  ;;  %v1276_v37 = vand.u32 4294901760, %v1275_v42  ;;  %v4076_v1 = vand.u32 4294901760, %v49_v15  ;;  %v4738_v42 = vand.u32 4294901760, %v3914_v60 }
  0x8b   :  { %2611 = vmatprep.subr.mxu1 %v1255_v52  ;;  %2585 = vmatpush3.msra.mxu0 %v3877_v56  ;;  %v1170_v26 = vsub.f32 %v3927_v7, %v4736_v40  ;;  %v4737_v40 = vand.u32 4294901760, %v3997_v25  ;;  %v1283_v12 = vand.u32 4294901760, %v1282_v0  ;;  %v4740_v52 = vand.u32 4294901760, %v3954_v13  ;;  %v4774_v38 = vld [vmem:[#allocation16_spill] sm:$0xff] }
  0x8c   :  { %2612 = vmatpush3.msra.mxu1 %v1143_v57  ;;  %2586 = vmatprep.subr.mxu0 %v3888_v2  ;;  %v4087_v2 = vsub.f32 %v66_v24, %v4032_v51  ;;  %v4741_v57 = vand.u32 4294901760, %v4023_v5  ;;  %v4105_v0 = vsub.f32 %v65_v55, %v4069_v11 }
  0x8d   :  { %2613 = vmatprep.subr.mxu1 %v1262_v19  ;;  %2587 = vmatpush3.msra.mxu0 %v3901_v32  ;;  %v1289_v34 = vsub.f32 %v3997_v25, %v4737_v40  ;;  %v4093_v19 = vsub.f32 %v50_v46, %v4062_v17  ;;  %v1177_v40 = vsub.f32 %v3954_v13, %v4740_v52  ;;  %v1171_v24 = vand.u32 4294901760, %v1170_v26 }
  0x8e   :  { %2614 = vmatpush3.msra.mxu1 %v4738_v42  ;;  %2588 = vmatprep.subr.mxu0 %v3929_v18  ;;  %v1296_v60 = vsub.f32 %v4023_v5, %v4741_v57  ;;  %4742 = vst [vmem:[#allocation33_spill] sm:$0xff] %v4105_v0  ;;  %v4109_v46 = vsub.f32 %v49_v15, %v4076_v1  ;;  %v4745_v26 = vand.u32 4294901760, %v3962_v59  ;;  %v4747_v15 = vand.u32 4294901760, %v4053_v41 }
  0x8f   :  { %4739 = vst [vmem:[#allocation32_spill] sm:$0xff] %v4093_v19  ;;  %2615 = vmatprep.subr.mxu1 %v1269_v23  ;;  %2589 = vmatpush3.msra.mxu0 %v3904_v29  ;;  %v4744_v23 = vand.u32 4294901760, %v4038_v30  ;;  %v1290_v55 = vand.u32 4294901760, %v1289_v34  ;;  %v4748_v57 = vand.u32 4294901760, %v4007_v36 }
  0x90   :  { %2616 = vmatpush3.msra.mxu1 %v1157_v50  ;;  %2590 = vmatprep.subr.mxu0 %v3985_v21  ;;  %4743 = vst [vmem:[#allocation34_spill] sm:$0xff] %v4109_v46  ;;  %v1184_v62 = vsub.f32 %v3962_v59, %v4745_v26  ;;  %v4746_v50 = vand.u32 4294901760, %v4050_v6  ;;  %v1303_v21 = vsub.f32 %v4053_v41, %v4747_v15  ;;  %v1178_v26 = vand.u32 4294901760, %v1177_v40 }
  0x91   :  { %v1090_v52 = vsub.f32 %v4038_v30, %v4744_v23  ;;  %2617 = vmatprep.subr.mxu1 %v1276_v37  ;;  %2591 = vmatpush3.msra.mxu0 %v3944_v3  ;;  %v1191_v37 = vsub.f32 %v4007_v36, %v4748_v57  ;;  %v4749_v3 = vand.u32 4294901760, %v4073_v16 }
  0x92   :  { %v1096_v42 = vsub.f32 %v4050_v6, %v4746_v50  ;;  %2618 = vmatpush3.msra.mxu1 %v1164_v54  ;;  %2592 = vmatprep.subr.mxu0 %v4016_v31  ;;  %v1297_v50 = vand.u32 4294901760, %v1296_v60  ;;  %v1185_v40 = vand.u32 4294901760, %v1184_v62  ;;  %v4750_v31 = vand.u32 4294901760, %v4060_v44 }
  0x93   :  { %2619 = vmatprep.subr.mxu1 %v1283_v12  ;;  %2593 = vmatpush3.msra.mxu0 %v4010_v61  ;;  %v1310_v15 = vsub.f32 %v4073_v16, %v4749_v3  ;;  %v1091_v54 = vand.u32 4294901760, %v1090_v52  ;;  %v4585_v12 = vand.u32 4294901760, %v4109_v46  ;;  %v1304_v34 = vand.u32 4294901760, %v1303_v21 }
  0x94   :  { %2620 = vmatpush3.msra.mxu1 %v1171_v24  ;;  %2594 = vmatprep.subr.mxu0 %v4032_v51  ;;  %v1198_v57 = vsub.f32 %v4060_v44, %v4750_v31  ;;  %v1097_v60 = vand.u32 4294901760, %v1096_v42  ;;  %v4751_v3 = vand.u32 4294901760, %v4087_v2  ;;  %v1192_v24 = vand.u32 4294901760, %v1191_v37 }
  0x95   :  { %2621 = vmatprep.subr.mxu1 %v1290_v55  ;;  %2595 = vmatpush3.msra.mxu0 %v4062_v17  ;;  %v4752_v62 = vand.u32 4294901760, %v4093_v19  ;;  %v1311_v31 = vand.u32 4294901760, %v1310_v15  ;;  %v4753_v55 = vand.u32 4294901760, %v4105_v0 }
  0x96   :  { %v1317_v23 = vsub.f32 %v4087_v2, %v4751_v3  ;;  %2622 = vmatpush3.msra.mxu1 %v1178_v26  ;;  %2596 = vmatprep.subr.mxu0 %v4069_v11  ;;  %v1199_v42 = vand.u32 4294901760, %v1198_v57  ;;  %v1212_v26 = vsub.f32 %v4109_v46, %v4585_v12  ;;  %v4757_v57 = vld [vmem:[#allocation28_spill] sm:$0xff]  ;;  %v4759_v3 = vld [vmem:[#allocation17_spill] sm:$0xff]  ;;  %v4772_v12 = vld [vmem:[#allocation18_spill] sm:$0xff] }
  0x97   :  { %v1205_v52 = vsub.f32 %v4093_v19, %v4752_v62  ;;  %2623 = vmatprep.subr.mxu1 %v1297_v50  ;;  %2597 = vmatpush3.msra.mxu0 %v4076_v1  ;;  %v1324_v21 = vsub.f32 %v4105_v0, %v4753_v55  ;;  %v4761_v62 = vld [vmem:[#allocation21_spill] sm:$0xff]  ;;  %v4764_v55 = vld [vmem:[#allocation10_spill] sm:$0xff] }
  0x98   :  { %1092 = vmatprep.mubr.f32.mxu0 %v1091_v54  ;;  %2624 = vmatpush3.msra.mxu1 %v1185_v40  ;;  %v1318_v37 = vand.u32 4294901760, %v1317_v23  ;;  %v1213_v54 = vand.u32 4294901760, %v1212_v26  ;;  %v4754_v23 = vld [vmem:[#allocation6_spill] sm:$0xff]  ;;  %v4756_v40 = vld [vmem:[#allocation7_spill] sm:$0xff] }
  0x99   :  { %1098 = vmatmul.mubr.f32.vlgmr.msra.gmra.mxu0 %v1097_v60  ;;  %2625 = vmatprep.subr.mxu1 %v1304_v34  ;;  %v1206_v50 = vand.u32 4294901760, %v1205_v52  ;;  %v1325_v15 = vand.u32 4294901760, %v1324_v21  ;;  %v4755_v34 = vld [vmem:[#allocation15_spill] sm:$0xff]  ;;  %v4762_v52 = vld [vmem:[#allocation29_spill] sm:$0xff]  ;;  %v4765_v21 = vld [vmem:[#allocation24_spill] sm:$0xff] }
  0x9a   :  { %2636 = vmatprep.subr.mxu0 %v3641_v22  ;;  %2626 = vmatpush3.msra.mxu1 %v1192_v24  ;;  %v4758_v60 = vld [vmem:[#allocation19_spill] sm:$0xff]  ;;  %v4760_v24 = vld [vmem:[#allocation8_spill] sm:$0xff] }
  0x9b   :  { %2637 = vmatpush3.msra.mxu0 %v3622_v33  ;;  %2627 = vmatprep.subr.mxu1 %v1311_v31  ;;  %v4763_v31 = vld [vmem:[#allocation9_spill] sm:$0xff]  ;;  %v4767_v26 = vld [vmem:[#allocation11_spill] sm:$0xff] }
  0x9c   :  { %2638 = vmatprep.subr.mxu0 %v3660_v8  ;;  %2628 = vmatpush3.msra.mxu1 %v1199_v42  ;;  %v4766_v42 = vld [vmem:[#allocation12_spill] sm:$0xff] }
  0x9d   :  { %2639 = vmatpush3.msra.mxu0 %v3647_v45  ;;  %2629 = vmatprep.subr.mxu1 %v1318_v37  ;;  %v4768_v37 = vld [vmem:[#allocation13_spill] sm:$0xff] }
  0x9e   :  { %2640 = vmatprep.subr.mxu0 %v3682_v49  ;;  %2630 = vmatpush3.msra.mxu1 %v1206_v50  ;;  %v4769_v50 = vld [vmem:[#allocation5_spill] sm:$0xff] }
  0x9f   :  { %2641 = vmatpush3.msra.mxu0 %v3672_v63  ;;  %2631 = vmatprep.subr.mxu1 %v1325_v15  ;;  %v4770_v15 = vld [vmem:[#allocation14_spill] sm:$0xff] }
  0xa0   :  { %2642 = vmatprep.subr.mxu0 %v3701_v9  ;;  %2632 = vmatpush3.msra.mxu1 %v1213_v54  ;;  %v4771_v54 = vld [vmem:[#allocation26_spill] sm:$0xff] }
  0xa1   :  { %2643 = vmatpush3.msra.mxu0 %v3694_v28  ;;  %1330 = vmatmul.mubr.f32.vlgmr.msra.gmra.mxu1 %v4000_v58  ;;  %v4773_v58 = vld [vmem:[#allocation27_spill] sm:$0xff] }
  0xa2   :  { %2644 = vmatprep.subr.mxu0 %v3719_v4  ;;  %2671 = vmatprep.subr.mxu1 %v3600_v20 }
  0xa3   :  { %2645 = vmatpush3.msra.mxu0 %v3735_v43  ;;  %2672 = vmatpush3.msra.mxu1 %v3592_v48 }
  0xa4   :  { %2646 = vmatprep.subr.mxu0 %v3774_v14  ;;  %2673 = vmatprep.subr.mxu1 %v3616_v27 }
  0xa5   :  { %2647 = vmatpush3.msra.mxu0 %v3770_v35  ;;  %2674 = vmatpush3.msra.mxu1 %v3605_v47 }
  0xa6   :  { %2648 = vmatprep.subr.mxu0 %v3836_v10  ;;  %2675 = vmatprep.subr.mxu1 %v4754_v23 }
  0xa7   :  { %2649 = vmatpush3.msra.mxu0 %v4755_v34  ;;  %2676 = vmatpush3.msra.mxu1 %v4756_v40 }
  0xa8   :  { %2650 = vmatprep.subr.mxu0 %v4757_v57  ;;  %2677 = vmatprep.subr.mxu1 %v4758_v60 }
  0xa9   :  { %2651 = vmatpush3.msra.mxu0 %v4759_v3  ;;  %2678 = vmatpush3.msra.mxu1 %v4760_v24 }
  0xaa   :  { %2652 = vmatprep.subr.mxu0 %v3918_v53  ;;  %2679 = vmatprep.subr.mxu1 %v4761_v62 }
  0xab   :  { %2653 = vmatpush3.msra.mxu0 %v4762_v52  ;;  %2680 = vmatpush3.msra.mxu1 %v4763_v31 }
  0xac   :  { %2654 = vmatprep.subr.mxu0 %v3947_v39  ;;  %2681 = vmatprep.subr.mxu1 %v4764_v55 }
  0xad   :  { %2655 = vmatpush3.msra.mxu0 %v3927_v7  ;;  %2682 = vmatpush3.msra.mxu1 %v4765_v21 }
  0xae   :  { %2656 = vmatprep.subr.mxu0 %v3997_v25  ;;  %2683 = vmatprep.subr.mxu1 %v4766_v42 }
  0xaf   :  { %2657 = vmatpush3.msra.mxu0 %v3954_v13  ;;  %2684 = vmatpush3.msra.mxu1 %v4767_v26 }
  0xb0   :  { %2658 = vmatprep.subr.mxu0 %v4023_v5  ;;  %2685 = vmatprep.subr.mxu1 %v4768_v37 }
  0xb1   :  { %2659 = vmatpush3.msra.mxu0 %v3962_v59  ;;  %2686 = vmatpush3.msra.mxu1 %v4769_v50 }
  0xb2   :  { %2660 = vmatprep.subr.mxu0 %v4053_v41  ;;  %2687 = vmatprep.subr.mxu1 %v4770_v15 }
  0xb3   :  { %2661 = vmatpush3.msra.mxu0 %v4007_v36  ;;  %2688 = vmatpush3.msra.mxu1 %v4771_v54 }
  0xb4   :  { %2662 = vmatprep.subr.mxu0 %v4073_v16  ;;  %2689 = vmatprep.subr.mxu1 %v4772_v12 }
  0xb5   :  { %2663 = vmatpush3.msra.mxu0 %v4060_v44  ;;  %2690 = vmatpush3.msra.mxu1 %v3877_v56 }
  0xb6   :  { %2664 = vmatprep.subr.mxu0 %v4087_v2  ;;  %2691 = vmatprep.subr.mxu1 %v4773_v58  ;;  %v4775_v58 = vand.u32 4294901760, %v3641_v22  ;;  %v4781_v22 = vand.u32 4294901760, %v3682_v49  ;;  %v4786_v49 = vand.u32 4294901760, %v4050_v6 }
  0xb7   :  { %2665 = vmatpush3.msra.mxu0 %v4093_v19  ;;  %2692 = vmatpush3.msra.mxu1 %v3901_v32  ;;  %v4776_v19 = vld [vmem:[#allocation23_spill] sm:$0xff]  ;;  %v4777_v32 = vand.u32 4294901760, %v3622_v33  ;;  %v4782_v33 = vand.u32 4294901760, %v3672_v63  ;;  %v4788_v63 = vand.u32 4294901760, %v3735_v43 }
  0xb8   :  { %2666 = vmatprep.subr.mxu0 %v4105_v0  ;;  %2693 = vmatprep.subr.mxu1 %v3929_v18  ;;  %v4778_v0 = vld [vmem:[#allocation31_spill] sm:$0xff] }
  0xb9   :  { %2667 = vmatpush3.msra.mxu0 %v4109_v46  ;;  %1465 = vmatprep.mubr.f32.mxu0 %v4038_v30  ;;  %v4779_v46 = vand.u32 4294901760, %v3660_v8  ;;  %v4783_v8 = vand.u32 4294901760, %v3701_v9  ;;  %v4789_v9 = vand.u32 4294901760, %v3774_v14  ;;  %v84_v43 = vld [vmem:[%s4449_s1 + $0x218] sm:$0xf] }
  0xba   :  { %2694 = vmatpush3.msra.mxu1 %v3904_v29  ;;  %1468 = vmatmul.mubr.f32.vlgmr.msra.gmra.mxu0 %v4050_v6  ;;  %v4780_v29 = vand.u32 4294901760, %v3647_v45  ;;  %v4784_v45 = vand.u32 4294901760, %v4038_v30  ;;  %v2355_v14 = vld.sshfl [vmem:[%s4448_s0 + $0x8] sm:$0x3 pattern:$0x76325410] }
  0xbb   :  { %2695 = vmatprep.subr.mxu1 %v4774_v38  ;;  %2706 = vmatprep.subr.mxu0 %v4775_v58  ;;  %v4799_v6 = vand.u32 4294901760, %v3997_v25  ;;  %v127_v58 = vsel %vm125_vm0, %v84_v43, 0  ;;  %v83_v30 = vld [vmem:[%s4449_s1 + $0x210] sm:$0xff]  ;;  %v4802_v25 = vand.u32 4294901760, %v3962_v59 }
  0xbc   :  { %2696 = vmatpush3.msra.mxu1 %v4776_v19  ;;  %2707 = vmatpush3.msra.mxu0 %v4777_v32  ;;  %v4785_v32 = vand.u32 4294901760, %v3694_v28  ;;  %v4790_v28 = vand.u32 4294901760, %v3770_v35  ;;  %v4797_v35 = vand.u32 4294901760, %v3947_v39  ;;  %v4800_v39 = vand.u32 4294901760, %v3954_v13 }
  0xbd   :  { %2697 = vmatprep.subr.mxu1 %v4778_v0  ;;  %2708 = vmatprep.subr.mxu0 %v4779_v46  ;;  %v123_v46 = vsel %vm122_vm1, %v2355_v14, 0  ;;  %v4803_v13 = vand.u32 4294901760, %v4053_v41  ;;  %v81_v41 = vld [vmem:[%s4449_s1 + $0x200] sm:$0xff] }
  0xbe   :  { %2698 = vmatpush3.msra.mxu1 %v4010_v61  ;;  %2709 = vmatpush3.msra.mxu0 %v4780_v29  ;;  %v4787_v29 = vand.u32 4294901760, %v3719_v4  ;;  %v4791_v4 = vand.u32 4294901760, %v3836_v10  ;;  %v4796_v10 = vand.u32 4294901760, %v4762_v52  ;;  %v4313_v59 = vand.u32 4294901760, %v123_v46 }
  0xbf   :  { %2699 = vmatprep.subr.mxu1 %v4032_v51  ;;  %2710 = vmatprep.subr.mxu0 %v4781_v22 }
  0xc0   :  { %2700 = vmatpush3.msra.mxu1 %v4062_v17  ;;  %2711 = vmatpush3.msra.mxu0 %v4782_v33 }
  0xc1   :  { %2701 = vmatprep.subr.mxu1 %v4069_v11  ;;  %2712 = vmatprep.subr.mxu0 %v4783_v8  ;;  %v2900_v8 = vmov 0.0  }
  0xc2   :  { %2702 = vmatpush3.msra.mxu1 %v4076_v1  ;;  %1572 = vmatprep.mubr.f32.mxu1 %v4784_v45 }
  0xc3   :  { %2713 = vmatpush3.msra.mxu0 %v4785_v32  ;;  %1576 = vmatmul.mubr.f32.vlgmr.msra.gmra.mxu1 %v4786_v49 }
  0xc4   :  { %2714 = vmatprep.subr.mxu0 %v4787_v29  ;;  %2741 = vmatprep.subr.mxu1 %v3600_v20  ;;  %v4792_v20 = vand.u32 4294901760, %v4755_v34  ;;  %v4804_v34 = vand.u32 4294901760, %v4007_v36 }
  0xc5   :  { %2715 = vmatpush3.msra.mxu0 %v4788_v63  ;;  %2742 = vmatpush3.msra.mxu1 %v3592_v48  ;;  %v4793_v48 = vand.u32 4294901760, %v4757_v57  ;;  %v4805_v57 = vand.u32 4294901760, %v4073_v16  ;;  %v4808_v16 = vld [vmem:[#allocation27_spill] sm:$0xff] }
  0xc6   :  { %2716 = vmatprep.subr.mxu0 %v4789_v9  ;;  %2743 = vmatprep.subr.mxu1 %v3616_v27  ;;  %v4794_v27 = vand.u32 4294901760, %v4759_v3 }
  0xc7   :  { %2717 = vmatpush3.msra.mxu0 %v4790_v28  ;;  %2744 = vmatpush3.msra.mxu1 %v3605_v47  ;;  %v4795_v47 = vand.u32 4294901760, %v3918_v53  ;;  %v4798_v53 = vand.u32 4294901760, %v3927_v7  ;;  %v4801_v7 = vand.u32 4294901760, %v4023_v5  ;;  %v82_v5 = vld [vmem:[%s4449_s1 + $0x208] sm:$0xff] }
  0xc8   :  { %2718 = vmatprep.subr.mxu0 %v4791_v4  ;;  %2745 = vmatprep.subr.mxu1 %v4754_v23  ;;  %v4300_v23 = vand.u32 4294901760, %v127_v58  ;;  %v4327_v3 = vand.u32 4294901760, %v82_v5 }
  0xc9   :  { %2719 = vmatpush3.msra.mxu0 %v4792_v20  ;;  %2746 = vmatpush3.msra.mxu1 %v4756_v40  ;;  %v4311_v40 = vand.u32 4294901760, %v83_v30 }
  0xca   :  { %2720 = vmatprep.subr.mxu0 %v4793_v48  ;;  %2747 = vmatprep.subr.mxu1 %v4758_v60  ;;  %v4806_v60 = vand.u32 4294901760, %v4060_v44  ;;  %v4325_v36 = vsub.f32 %v127_v58, %v4300_v23  ;;  %v4338_v44 = vand.u32 4294901760, %v81_v41 }
  0xcb   :  { %2721 = vmatpush3.msra.mxu0 %v4794_v27  ;;  %2748 = vmatpush3.msra.mxu1 %v4760_v24  ;;  %v4807_v24 = vand.u32 4294901760, %v4087_v2  ;;  %v4814_v2 = vld [vmem:[#allocation34_spill] sm:$0xff] }
  0xcc   :  { %2722 = vmatprep.subr.mxu0 %v4795_v47  ;;  %2749 = vmatprep.subr.mxu1 %v4761_v62  ;;  %v4809_v62 = vld [vmem:[#allocation32_spill] sm:$0xff]  ;;  %v4358_v22 = vsub.f32 %v81_v41, %v4338_v44 }
  0xcd   :  { %2723 = vmatpush3.msra.mxu0 %v4796_v10  ;;  %2750 = vmatpush3.msra.mxu1 %v4763_v31  ;;  %v4810_v52 = vand.u32 4294901760, %v4809_v62  ;;  %v4341_v31 = vsub.f32 %v123_v46, %v4313_v59 }
  0xce   :  { %2724 = vmatprep.subr.mxu0 %v4797_v35  ;;  %2751 = vmatprep.subr.mxu1 %v4764_v55  ;;  %v4811_v55 = vld [vmem:[#allocation20_spill] sm:$0xff]  ;;  %v1980_v32 = vand.u32 4294901760, %v4358_v22 }
  0xcf   :  { %2725 = vmatpush3.msra.mxu0 %v4798_v53  ;;  %2752 = vmatpush3.msra.mxu1 %v4765_v21  ;;  %v4812_v21 = vld [vmem:[#allocation33_spill] sm:$0xff]  ;;  %v2354_v53 = vld [vmem:[%s4450_s2] ss:$0 sm:$0xff]  ;;  %s2902_s2 = smov [#allocation2]  }
  0xd0   :  { %2726 = vmatprep.subr.mxu0 %v4799_v6  ;;  %2753 = vmatprep.subr.mxu1 %v4766_v42  ;;  %v4815_v42 = vand.u32 4294901760, %v4814_v2  ;;  %s2346_s17 = sshll.u32 %s2902_s2, 4  ;;  %s2347_s17 = int_to_ptr.vmem [resolvable:$true] %s2346_s17 }
  0xd1   :  { %2727 = vmatpush3.msra.mxu0 %v4800_v39  ;;  %2754 = vmatpush3.msra.mxu1 %v4767_v26  ;;  %v4350_v26 = vsub.f32 %v82_v5, %v4327_v3  ;;  %s2877_s18 = scalar_lea.vmem %s2347_s17, 32  ;;  %p2882_p1 = scmp.lt.s32.totalorder %s2347_s17, %s2347_s17 }
  0xd2   :  { %2728 = vmatprep.subr.mxu0 %v4801_v7  ;;  %2755 = vmatprep.subr.mxu1 %v4768_v37  ;;  %v1959_v37 = vand.u32 4294901760, %v4325_v36  ;;  %p2878_p0 = scmp.ne.s32.totalorder %s2347_s17, %s2877_s18  ;;  %p2883_p2 = scmp.lt.s32.totalorder %s2877_s18, %s2877_s18 }
  0xd3   :  { %2729 = vmatpush3.msra.mxu0 %v4802_v25  ;;  %2756 = vmatpush3.msra.mxu1 %v4769_v50  ;;  %v4816_v50 = vld [vmem:[#allocation25_spill] sm:$0xff]  ;;  %v1973_v45 = vand.u32 4294901760, %v4350_v26 }
  0xd4   :  { %2730 = vmatprep.subr.mxu0 %v4803_v13  ;;  %2757 = vmatprep.subr.mxu1 %v4770_v15  ;;  %v4817_v15 = vld [vmem:[#allocation22_spill] sm:$0xff]  ;;  %p2884_p3 = por %p2883_p2, %p2882_p1 }
  0xd5   :  { %2731 = vmatpush3.msra.mxu0 %v4804_v34  ;;  %2758 = vmatpush3.msra.mxu1 %v4771_v54  ;;  %v4818_v54 = vld [vmem:[#allocation30_spill] sm:$0xff] }
  0xd6   :  { %2732 = vmatprep.subr.mxu0 %v4805_v57  ;;  %2759 = vmatprep.subr.mxu1 %v4772_v12  ;;  %v4336_v12 = vsub.f32 %v83_v30, %v4311_v40  ;;  %p2885_p4 = pnand %p2884_p3, %p2878_p0 }
  0xd7   :  { %2733 = vmatpush3.msra.mxu0 %v4806_v60  ;;  %2760 = vmatpush3.msra.mxu1 %v3877_v56  ;;  %v4813_v56 = vand.u32 4294901760, %v4812_v21 }
  0xd8   :  { %2734 = vmatprep.subr.mxu0 %v4807_v24  ;;  %2761 = vmatprep.subr.mxu1 %v4808_v16  ;;  %v1966_v33 = vand.u32 4294901760, %v4336_v12 }
  0xd9   :  { %2735 = vmatpush3.msra.mxu0 %v4810_v52  ;;  %2762 = vmatpush3.msra.mxu1 %v4811_v55 }
  0xda   :  { %2736 = vmatprep.subr.mxu0 %v4813_v56  ;;  %2763 = vmatprep.subr.mxu1 %v3929_v18  ;;  %v1924_v18 = vand.u32 4294901760, %v4341_v31 }
  0xdb   :  { %2737 = vmatpush3.msra.mxu0 %v4815_v42  ;;  %1742 = vmatprep.mubr.f32.mxu0 %v4816_v50 }
  0xdc   :  { %2764 = vmatpush3.msra.mxu1 %v4817_v15  ;;  %1744 = vmatmul.mubr.f32.vlgmr.msra.gmra.mxu0 %v4818_v54 }
  0xdd   :  { %2765 = vmatprep.subr.mxu1 %v4774_v38  ;;  %2806 = vmatprep.subr.mxu0 %v2900_v8  ;;  %v1960_v38 = vsub.f32 %v4325_v36, %v1959_v37 }
  0xde   :  { %2766 = vmatpush3.msra.mxu1 %v4776_v19  ;;  %2807 = vmatpush3.msra.mxu0 %v4300_v23  ;;  %v1925_v19 = vsub.f32 %v4341_v31, %v1924_v18 }
  0xdf   :  { %2767 = vmatprep.subr.mxu1 %v4778_v0  ;;  %2808 = vmatprep.subr.mxu0 %v2900_v8  ;;  %v1967_v0 = vsub.f32 %v4336_v12, %v1966_v33 }
  0xe0   :  { %2768 = vmatpush3.msra.mxu1 %v4010_v61  ;;  %2809 = vmatpush3.msra.mxu0 %v4311_v40  ;;  %v1961_v61 = vand.u32 4294901760, %v1960_v38  ;;  %v1926_v49 = vand.u32 4294901760, %v1925_v19 }
  0xe1   :  { %2769 = vmatprep.subr.mxu1 %v4032_v51  ;;  %2810 = vmatprep.subr.mxu0 %v2900_v8  ;;  %v1974_v51 = vsub.f32 %v4350_v26, %v1973_v45  ;;  %v1968_v29 = vand.u32 4294901760, %v1967_v0 }
  0xe2   :  { %2770 = vmatpush3.msra.mxu1 %v4062_v17  ;;  %1846 = vmatprep.mubr.f32.mxu1 %v4816_v50  ;;  %v1981_v17 = vsub.f32 %v4358_v22, %v1980_v32 }
  0xe3   :  { %2771 = vmatprep.subr.mxu1 %v4069_v11  ;;  %2811 = vmatpush3.msra.mxu0 %v4327_v3 }
  0xe4   :  { %2772 = vmatpush3.msra.mxu1 %v4076_v1  ;;  %2812 = vmatprep.subr.mxu0 %v2900_v8  ;;  %v1975_v1 = vand.u32 4294901760, %v1974_v51  ;;  %v1982_v11 = vand.u32 4294901760, %v1981_v17 }
  0xe5   :  { %1848 = vmatmul.mubr.f32.vlgmr.msra.gmra.mxu1 %v4818_v54  ;;  %2817 = vmatprep.subr.mxu1 %v2900_v8 }
  0xe6   :  { %2813 = vmatpush3.msra.mxu0 %v4338_v44  ;;  %2818 = vmatpush3.msra.mxu1 %v1961_v61 }
  0xe7   :  { %2814 = vmatprep.mubr.msk.f32.mxu0 %vm2901_vm2, %v2900_v8  ;;  %2819 = vmatprep.subr.mxu1 %v2900_v8 }
  0xe8   :  { %2828 = vmatprep.subr.mxu0 %v2900_v8  ;;  %2815 = vmatmul.mubr.f32.vlgmr.msra.gmra.mxu0 %v1926_v49 }
  0xe9   :  { %2820 = vmatpush3.msra.mxu1 %v1968_v29  ;;  %2829 = vmatpush3.msra.mxu0 %v4325_v36 }
  0xea   :  { %2821 = vmatprep.subr.mxu1 %v2900_v8  ;;  %2830 = vmatprep.subr.mxu0 %v2900_v8 }
  0xeb   :  { %2822 = vmatpush3.msra.mxu1 %v1975_v1  ;;  %2831 = vmatpush3.msra.mxu0 %v4336_v12 }
  0xec   :  { %2823 = vmatprep.subr.mxu1 %v2900_v8  ;;  %2832 = vmatprep.subr.mxu0 %v2900_v8 }
  0xed   :  { %2824 = vmatpush3.msra.mxu1 %v1982_v11  ;;  %2825 = vmatprep.mubr.msk.f32.mxu1 %vm2901_vm2, %v2900_v8 }
  0xee   :  { %2833 = vmatpush3.msra.mxu0 %v4350_v26  ;;  %2826 = vmatmul.mubr.f32.vlgmr.msra.gmra.mxu1 %v4313_v59 }
  0xef   :  { %2834 = vmatprep.subr.mxu0 %v2900_v8  ;;  %2839 = vmatprep.subr.mxu1 %v2900_v8 }
  0xf0   :  { %2835 = vmatpush3.msra.mxu0 %v4358_v22  ;;  %2836 = vmatprep.mubr.msk.f32.mxu0 %vm2901_vm2, %v2900_v8 }
  0xf1   :  { %2840 = vmatpush3.msra.mxu1 %v4300_v23  ;;  %2837 = vmatmul.mubr.f32.vlgmr.msra.gmra.mxu0 %v4341_v31 }
  0xf2   :  { %2841 = vmatprep.subr.mxu1 %v2900_v8  ;;  %2850 = vmatprep.subr.mxu0 %v2900_v8 }
  0xf3   :  { %2842 = vmatpush3.msra.mxu1 %v4311_v40  ;;  %2851 = vmatpush3.msra.mxu0 %v1959_v37 }
  0xf4   :  { %2843 = vmatprep.subr.mxu1 %v2900_v8  ;;  %2852 = vmatprep.subr.mxu0 %v2900_v8 }
  0xf5   :  { %2844 = vmatpush3.msra.mxu1 %v4327_v3  ;;  %2853 = vmatpush3.msra.mxu0 %v1966_v33  ;;  %v2423_v9 = vpop.f32.mrf.mxu1 }
  0xf6   :  { %2845 = vmatprep.subr.mxu1 %v2900_v8  ;;  %2854 = vmatprep.subr.mxu0 %v2900_v8 }
  0xf7   :  { %2846 = vmatpush3.msra.mxu1 %v4338_v44  ;;  %2847 = vmatprep.mubr.msk.f32.mxu1 %vm2901_vm2, %v2900_v8  ;;  %v2424_v20 = vpop.f32.mrf.mxu1 }
  0xf8   :  { %2855 = vmatpush3.msra.mxu0 %v1973_v45  ;;  %2848 = vmatmul.mubr.f32.vlgmr.msra.gmra.mxu1 %v1924_v18  ;;  %v2388_v63 = vpop.f32.mrf.mxu0  ;;  %v2425_v39 = vadd.f32 %v2424_v20, %v2423_v9 }
  0xf9   :  { %2856 = vmatprep.subr.mxu0 %v2900_v8  ;;  %2861 = vmatprep.subr.mxu1 %v2900_v8 }
  0xfa   :  { %2857 = vmatpush3.msra.mxu0 %v1980_v32  ;;  %2858 = vmatprep.mubr.msk.f32.mxu0 %vm2901_vm2, %v2900_v8  ;;  %v2389_v28 = vpop.f32.mrf.mxu0 }
  0xfb   :  { %2862 = vmatpush3.msra.mxu1 %v4300_v23  ;;  %2859 = vmatmul.mubr.f32.vlgmr.msra.gmra.mxu0 %v4313_v59  ;;  %v2390_v43 = vadd.f32 %v2389_v28, %v2388_v63 }
  0xfc   :  { %2863 = vmatprep.subr.mxu1 %v2900_v8  ;;  %2869 = vmatprep.mubr.msk.f32.mxu1 %vm2901_vm2, %v2900_v8 }
  0xfd   :  { %2864 = vmatpush3.msra.mxu1 %v4311_v40  ;;  %v238_v58 = vadd.f32 %v2390_v43, %v2354_v53 }
  0xfe   :  { %2865 = vmatprep.subr.mxu1 %v2900_v8 }
  0xff   :  { %2866 = vmatpush3.msra.mxu1 %v4327_v3  ;;  %v470_v23 = vadd.f32 %v2425_v39, %v238_v58 }
 0x100   :  { %2867 = vmatprep.subr.mxu1 %v2900_v8 }
 0x101   :  { %2868 = vmatpush3.msra.mxu1 %v4338_v44 }
 0x102   :  { %2870 = vmatmul.mubr.f32.vlgmr.msra.gmra.mxu1 %v4313_v59 }
 0x118   :  { %v2458_v4 = vpop.f32.mrf.mxu0 }
 0x11a   :  { %v2493_v48 = vpop.f32.mrf.mxu1  ;;  %v2459_v27 = vpop.f32.mrf.mxu0 }
 0x11b   :  { %v2460_v30 = vadd.f32 %v2459_v27, %v2458_v4 }
 0x11c   :  { %v2494_v10 = vpop.f32.mrf.mxu1 }
 0x11d   :  { %v2495_v13 = vadd.f32 %v2494_v10, %v2493_v48  ;;  %v608_v34 = vadd.f32 %v2460_v30, %v470_v23 }
 0x11f   :  { %v716_v57 = vadd.f32 %v2495_v13, %v608_v34 }
 0x138   :  { %v2528_v47 = vpop.f32.mrf.mxu0 }
 0x13a   :  { %v2529_v14 = vpop.f32.mrf.mxu0 }
 0x13b   :  { %v2530_v40 = vadd.f32 %v2529_v14, %v2528_v47 }
 0x13d   :  { %v2563_v35 = vpop.f32.mrf.mxu1  ;;  %v884_v3 = vadd.f32 %v2530_v40, %v716_v57 }
 0x13f   :  { %v2564_v7 = vpop.f32.mrf.mxu1 }
 0x140   :  { %v2565_v41 = vadd.f32 %v2564_v7, %v2563_v35 }
 0x142   :  { %v988_v62 = vadd.f32 %v2565_v41, %v884_v3 }
 0x159   :  { %v2598_v6 = vpop.f32.mrf.mxu0 }
 0x15b   :  { %v2599_v25 = vpop.f32.mrf.mxu0 }
 0x15c   :  { %v2600_v24 = vadd.f32 %v2599_v25, %v2598_v6 }
 0x15e   :  { %v1100_v44 = vadd.f32 %v2600_v24, %v988_v62 }
 0x161   :  { %v2633_v46 = vpop.f32.mrf.mxu1 }
 0x163   :  { %v2634_v59 = vpop.f32.mrf.mxu1 }
 0x164   :  { %v2635_v52 = vadd.f32 %v2634_v59, %v2633_v46 }
 0x166   :  { %v1332_v56 = vadd.f32 %v2635_v52, %v1100_v44 }
 0x17a   :  { %v2668_v5 = vpop.f32.mrf.mxu0 }
 0x17c   :  { %v2669_v36 = vpop.f32.mrf.mxu0 }
 0x17d   :  { %v2670_v31 = vadd.f32 %v2669_v36, %v2668_v5 }
 0x17f   :  { %v1470_v26 = vadd.f32 %v2670_v31, %v1332_v56 }
 0x183   :  { %v2703_v60 = vpop.f32.mrf.mxu1 }
 0x185   :  { %v2704_v12 = vpop.f32.mrf.mxu1 }
 0x186   :  { %v2705_v2 = vadd.f32 %v2704_v12, %v2703_v60 }
 0x188   :  { %v1578_v15 = vadd.f32 %v2705_v2, %v1470_v26 }
 0x19c   :  { %v2738_v16 = vpop.f32.mrf.mxu0 }
 0x19e   :  { %v2739_v21 = vpop.f32.mrf.mxu0 }
 0x19f   :  { %v2740_v37 = vadd.f32 %v2739_v21, %v2738_v16 }
 0x1a1   :  { %v1746_v18 = vadd.f32 %v2740_v37, %v1578_v15 }
 0x1a5   :  { %v2773_v55 = vpop.f32.mrf.mxu1 }
 0x1a7   :  { %v2774_v42 = vpop.f32.mrf.mxu1 }
 0x1a8   :  { %v1928_v50 = vpop.f32.mrf.mxu0  ;;  %v2775_v54 = vadd.f32 %v2774_v42, %v2773_v55 }
 0x1aa   :  { %v2816_v22 = vpop.f32.mrf.mxu0  ;;  %v1850_v33 = vadd.f32 %v2775_v54, %v1746_v18 }
 0x1ac   :  { %v1929_v19 = vadd.f32 %v1928_v50, %v1850_v33 }
 0x1ae   :  { %v2019_v8 = vpop.f32.mrf.mxu1 }
 0x1af   :  { %v2020_v32 = vadd.f32 %v2019_v8, %v1929_v19 }
 0x1b0   :  { %v2827_v38 = vpop.f32.mrf.mxu1 }
 0x1b1   :  { %v2099_v45 = vpop.f32.mrf.mxu0 }
 0x1b2   :  { %v2100_v51 = vadd.f32 %v2099_v45, %v2020_v32 }
 0x1b3   :  { %v2838_v0 = vpop.f32.mrf.mxu0 }
 0x1b8   :  { %v2176_v61 = vpop.f32.mrf.mxu1 }
 0x1b9   :  { %v2177_v17 = vadd.f32 %v2176_v61, %v2100_v51 }
 0x1ba   :  { %v2849_v49 = vpop.f32.mrf.mxu1 }
 0x1bb   :  { %v2259_v29 = vpop.f32.mrf.mxu0 }
 0x1bc   :  { %v2260_v11 = vadd.f32 %v2259_v29, %v2177_v17 }
 0x1bd   :  { %v2860_v1 = vpop.f32.mrf.mxu0 }
 0x1c2   :  { %v2334_v63 = vpop.f32.mrf.mxu1 }
 0x1c3   :  { %v2335_v9 = vadd.f32 %v2334_v63, %v2260_v11 }
 0x1c4   :  { %v2871_v28 = vpop.f32.mrf.mxu1 }
 0x1c5   :  { %2339 = vst.msk [vmem:[#allocation2] sm:$0x3] %vm2338_vm3, %v2335_v9 }
 0x1c6   :  { %2888 = shalt.err (!%p2885_p4)
}
 0x1c7   :  { %2349 = dma.vmem_to_hbm [thread:$0]  %s2347_s17, 32, %s4451_s3, [#allocation3]  }
 0x1c8   :  { %2897 = dma.done.wait [#allocation3], 32  }
 0x1c9   :  { %2898 = vsyncadd [#allocation3], 4294967264 }
 0x1ca   :  { %2353 = vsyncpa [#allocation3], 1 }

</bundles_post_ra>
